<compile_context>
chip_gen: v5e
topology: v5e:2x2
jax: 0.10.0
libtpu: 0.0.40
codegen_flags: <defaults>
</compile_context>

<pallas_src>
import jax
import jax.numpy as jnp
from jax import lax
from jax.experimental import pallas as pl
from jax.experimental.pallas import tpu as pltpu


# ----------------------------- in-kernel helpers -----------------------------

def _bn_relu(x, gamma, beta, eps=1e-5):
    """BatchNorm1d (training-mode batch stats) + ReLU, all f32 on the VPU."""
    mean = jnp.mean(x, axis=0, keepdims=True)
    diff = x - mean
    var = jnp.mean(diff * diff, axis=0, keepdims=True)
    y = diff * lax.rsqrt(var + eps) * gamma + beta
    return jnp.maximum(y, 0.0)


def _gat_layer(x, cnt, w_bf16, att_src, att_dst, bias, heads, out_ch):
    """One GATConv (concat=True, negative_slope=0.2, self-loops already in `cnt`).

    x:[N,Din] f32   w_bf16:[Din,H*C] bf16   att_src/att_dst/bias:[1,H*C] f32
    cnt:[N,N] f32 (row i = target node, column j = source node, value = #edges j->i)
    Returns [N, H*C] f32 (multi-head concat + bias), kept entirely in registers.
    """
    xp = jnp.dot(x.astype(jnp.bfloat16), w_bf16,
                 preferred_element_type=jnp.float32)                  # [N, H*C]
    heads_out = []
    for h in range(heads):
        sl = slice(h * out_ch, (h + 1) * out_ch)
        xph = xp[:, sl]                                               # [N, C]
        # per-target logit a_dst[i] = <xph[i], att_dst_h>
        a_dst = jnp.sum(xph * att_dst[:, sl], axis=1, keepdims=True)  # [N, 1]
        # per-source logit as a row vector: a_src_row[0, j] = <xph[j], att_src_h>
        a_src_row = lax.dot_general(att_src[:, sl], xph,
                                    (((1,), (1,)), ((), ())),
                                    preferred_element_type=jnp.float32)  # [1, N]
        e = a_dst + a_src_row                      # e[i,j] = a_dst[i] + a_src[j]
        e = jnp.maximum(e, 0.2 * e)                # LeakyReLU(0.2)
        # count-weighted softmax over sources; non-edges (cnt==0) contribute 0.
        # emax is taken over all columns (shift-invariant); self-loops keep the
        # denominator strictly positive.
        emax = jnp.max(e, axis=1, keepdims=True)
        wgt = cnt * jnp.exp(e - emax)
        inv = pl.reciprocal(jnp.sum(wgt, axis=1, keepdims=True), approx=True)
        att = wgt * inv
        heads_out.append(jnp.dot(att.astype(jnp.bfloat16),
                                 xph.astype(jnp.bfloat16),
                                 preferred_element_type=jnp.float32))
    return jnp.concatenate(heads_out, axis=1) + bias                  # lane-dense


# ----------------------------- fused kernel -----------------------------

def _make_fused_kernel(num_stacked, heads, hidden):
    """Kernel closure over the static layer count / head count / hidden size."""

    def kernel(cnt_ref, pool_ref, x_ref,
               w0_ref, vecf_ref, w1_ref, ws_ref, vechc_ref, wl_ref, bl_ref,
               o_ref):
        cnt = cnt_ref[...].astype(jnp.float32)
        vecf = vecf_ref[...]                        # [3, F]: b0 / gamma0 / beta0

        # x = relu(bn0(linear(x)))
        x = jnp.dot(x_ref[...].astype(jnp.bfloat16), w0_ref[...],
                    preferred_element_type=jnp.float32) + vecf[0:1, :]
        x = _bn_relu(x, vecf[1:2, :], vecf[2:3, :])

        # conv1 -> bn1 -> relu   (vechc_ref[l] = [att_src, att_dst, bias, gamma, beta])
        v = vechc_ref[0]                            # [5, H*C]
        x = _gat_layer(x, cnt, w1_ref[...], v[0:1, :], v[1:2, :], v[2:3, :],
                       heads, hidden)
        x = _bn_relu(x, v[3:4, :], v[4:5, :])

        # conv2, conv3, conv_extra[*]  (stacked params, static unroll)
        for l in range(num_stacked):
            v = vechc_ref[l + 1]
            x = _gat_layer(x, cnt, ws_ref[l], v[0:1, :], v[1:2, :], v[2:3, :],
                           heads, hidden)
            x = _bn_relu(x, v[3:4, :], v[4:5, :])

        # global_mean_pool + final linear
        pooled = jnp.dot(pool_ref[...], x.astype(jnp.bfloat16),
                         preferred_element_type=jnp.float32)
        o_ref[...] = jnp.dot(pooled.astype(jnp.bfloat16), wl_ref[...],
                             preferred_element_type=jnp.float32) + bl_ref[...]

    return kernel


def _full_spec(shape):
    # whole-array block (everything fits in VMEM with huge margin at these sizes)
    return pl.BlockSpec(shape, lambda: (0,) * len(shape))


def gat_forward(params, x, cnt, pool, heads, hidden_channels):
    """Single fused pallas_call for the whole GAT_jz forward."""
    num_stacked = params["ws"].shape[0]
    num_graphs = pool.shape[0]
    num_classes = params["wl"].shape[1]

    args = (cnt, pool, x.astype(jnp.float32),
            params["w0"], params["vec_f"], params["w1"],
            params["ws"], params["vec_hc"], params["wl"], params["bl"])

    kernel = _make_fused_kernel(num_stacked, heads, hidden_channels)
    # TODO(synk): at larger N (and on v7x's 2 TensorCores / 64 MiB VMEM), tile the
    # target-node rows over a "parallel" grid axis and turn the BatchNorm batch
    # stats into a two-pass / grid-accumulator reduction; also pad H*C and the
    # output to 128-lane multiples for lane-dense stores.
    return pl.pallas_call(
        kernel,
        out_shape=jax.ShapeDtypeStruct((num_graphs, num_classes), jnp.float32),
        in_specs=[_full_spec(a.shape) for a in args],
        out_specs=_full_spec((num_graphs, num_classes)),
        compiler_params=pltpu.CompilerParams(vmem_limit_bytes=64 * 1024 * 1024),
    )(*args)


# ----------------------------- plain-JAX glue -----------------------------

def build_adj_count(edge_index, num_nodes):
    """cnt[i, j] = number of edges j -> i; self-loops removed then re-added once
    (matches GATConv(add_self_loops=True), keeps duplicate-edge multiplicity for
    the softmax like PyG scatter-softmax). Stored bf16 (exact for small counts)."""
    src, dst = edge_index[0], edge_index[1]
    cnt = jnp.zeros((num_nodes, num_nodes), jnp.float32)
    cnt = cnt.at[dst, src].add(1.0)
    eye = jnp.eye(num_nodes, dtype=jnp.float32)
    return (cnt * (1.0 - eye) + eye).astype(jnp.bfloat16)


def build_pool_matrix(batch, num_graphs, num_nodes):
    """P[g, i] = 1/count_g if batch[i]==g else 0  (global mean pool), bf16."""
    onehot = (batch[None, :] == jnp.arange(num_graphs)[:, None]).astype(jnp.float32)
    counts = jnp.sum(onehot, axis=1, keepdims=True)
    return (onehot / jnp.maximum(counts, 1.0)).astype(jnp.bfloat16)


def init_params(key, num_node_features, hidden_channels, num_classes,
                num_layers, heads):
    """Deterministic synthetic parameters, shapes matching the PyTorch module.
    Weight matrices are stored bf16 (MXU operands); the small per-layer vectors
    are coalesced into two stacked f32 arrays."""
    hc = heads * hidden_channels
    n_stacked = 2 + int(num_layers)            # conv2, conv3, conv_extra[*]

    def unif(k, shape, fan_in):
        s = 1.0 / jnp.sqrt(jnp.float32(fan_in))
        return jax.random.uniform(k, shape, jnp.float32, -s, s)

    keys = iter(jax.random.split(key, 8 + 3 * (1 + n_stacked)))

    # linear + bn0  -> vec_f rows: [bias, gamma, beta]
    w0 = unif(next(keys), (num_node_features, num_node_features), num_node_features)
    b0 = unif(next(keys), (num_node_features,), num_node_features)
    vec_f = jnp.stack([b0,
                       jnp.ones((num_node_features,), jnp.float32),
                       jnp.zeros((num_node_features,), jnp.float32)])     # [3, F]

    def gat_vecs(fan_in):
        s = 1.0 / jnp.sqrt(jnp.float32(fan_in))
        att_src = jax.random.uniform(next(keys), (hc,), jnp.float32, -s, s)
        att_dst = jax.random.uniform(next(keys), (hc,), jnp.float32, -s, s)
        return jnp.stack([att_src, att_dst,
                          jnp.zeros((hc,), jnp.float32),   # GATConv bias init = 0
                          jnp.ones((hc,), jnp.float32),    # BN gamma
                          jnp.zeros((hc,), jnp.float32)])  # BN beta   -> [5, hc]

    w1 = unif(next(keys), (num_node_features, hc), num_node_features)
    vecs = [gat_vecs(num_node_features)]
    ws = []
    for _ in range(n_stacked):
        ws.append(unif(next(keys), (hc, hc), hc))
        vecs.append(gat_vecs(hc))
    ws = jnp.stack(ws)                               # [n_stacked, hc, hc]
    vec_hc = jnp.stack(vecs)                         # [1 + n_stacked, 5, hc]

    wl = unif(next(keys), (hc, num_classes), hc)
    bl = unif(next(keys), (1, num_classes), hc)

    return dict(
        w0=w0.astype(jnp.bfloat16), vec_f=vec_f,
        w1=w1.astype(jnp.bfloat16), ws=ws.astype(jnp.bfloat16), vec_hc=vec_hc,
        wl=wl.astype(jnp.bfloat16), bl=bl,
    )


# ----------------------------- Main -----------------------------

if __name__ == "__main__":
    num_nodes = 16
    num_node_features = 8
    hidden_channels = 32
    num_classes = 3
    num_layers = 2
    heads = 2
    num_graphs = 2

    key = jax.random.PRNGKey(0)
    kx, ke = jax.random.split(key, 2)

    x = jax.random.normal(kx, (num_nodes, num_node_features), jnp.float32)

    # random directed edges, then symmetrize (undirected graph)
    num_edges = 32
    src = jax.random.randint(ke, (num_edges,), 0, num_nodes)
    dst = jax.random.randint(jax.random.fold_in(ke, 1), (num_edges,), 0, num_nodes)
    edge_index = jnp.stack(
        [jnp.concatenate([src, dst]), jnp.concatenate([dst, src])], axis=0
    ).astype(jnp.int32)

    # first 8 nodes -> graph 0, last 8 nodes -> graph 1
    batch = jnp.concatenate(
        [jnp.zeros((8,), jnp.int32), jnp.ones((8,), jnp.int32)]
    )

    # graph structure is static across calls -> precompute once (hoisted glue)
    cnt = build_adj_count(edge_index, num_nodes)
    pool = build_pool_matrix(batch, num_graphs, num_nodes)

    params = init_params(
        jax.random.PRNGKey(12345),
        num_node_features, hidden_channels, num_classes, num_layers, heads,
    )

    out = gat_forward(params, x, cnt, pool, heads, hidden_channels)
    out = jax.block_until_ready(out)
    assert out.shape == (num_graphs, num_classes)
    assert bool(jnp.all(jnp.isfinite(out)))
    print("KERNEL_OK")
</pallas_src>

<mosaic_0001>
module attributes {stable_mosaic.version = 11 : i64} {
  func.func @kernel(%arg0: memref<16x16xbf16, #tpu.memory_space<vmem>>, %arg1: memref<2x16xbf16, #tpu.memory_space<vmem>>, %arg2: memref<16x8xf32, #tpu.memory_space<vmem>>, %arg3: memref<8x8xbf16, #tpu.memory_space<vmem>>, %arg4: memref<3x8xf32, #tpu.memory_space<vmem>>, %arg5: memref<8x64xbf16, #tpu.memory_space<vmem>>, %arg6: memref<4x64x64xbf16, #tpu.memory_space<vmem>>, %arg7: memref<5x5x64xf32, #tpu.memory_space<vmem>>, %arg8: memref<64x3xbf16, #tpu.memory_space<vmem>>, %arg9: memref<1x3xf32, #tpu.memory_space<vmem>>, %arg10: memref<2x3xf32, #tpu.memory_space<vmem>>) attributes {dimension_semantics = [], scalar_prefetch = 0 : i64, scratch_operands = 0 : i64, tpu.core_type = #tpu.core_type<tc>} {
    %c0 = arith.constant 0 : index
    %c0_0 = arith.constant 0 : index
    %0 = vector.load %arg0[%c0, %c0_0] : memref<16x16xbf16, #tpu.memory_space<vmem>>, vector<16x16xbf16>
    %1 = arith.extf %0 : vector<16x16xbf16> to vector<16x16xf32>
    %c0_1 = arith.constant 0 : index
    %c0_2 = arith.constant 0 : index
    %2 = vector.load %arg4[%c0_1, %c0_2] : memref<3x8xf32, #tpu.memory_space<vmem>>, vector<3x8xf32>
    %c0_3 = arith.constant 0 : index
    %c0_4 = arith.constant 0 : index
    %3 = vector.load %arg2[%c0_3, %c0_4] : memref<16x8xf32, #tpu.memory_space<vmem>>, vector<16x8xf32>
    %4 = arith.truncf %3 : vector<16x8xf32> to vector<16x8xbf16>
    %c0_5 = arith.constant 0 : index
    %c0_6 = arith.constant 0 : index
    %5 = vector.load %arg3[%c0_5, %c0_6] : memref<8x8xbf16, #tpu.memory_space<vmem>>, vector<8x8xbf16>
    %cst = arith.constant dense<0.000000e+00> : vector<16x8xf32>
    %6 = tpu.matmul %4, %5, %cst {dimension_numbers = #tpu.dot_dimension_numbers<[1], [0], [0], [1], [0, 0, 1, 1], [], []>} : vector<16x8xbf16>, vector<8x8xbf16>, vector<16x8xf32> -> vector<16x8xf32>
    %7 = vector.extract_strided_slice %2 {offsets = [0, 0], sizes = [1, 8], strides = [1, 1]} : vector<3x8xf32> to vector<1x8xf32>
    %8 = vector.broadcast %7 : vector<1x8xf32> to vector<16x8xf32>
    %9 = arith.addf %6, %8 : vector<16x8xf32>
    %10 = vector.extract_strided_slice %2 {offsets = [1, 0], sizes = [1, 8], strides = [1, 1]} : vector<3x8xf32> to vector<1x8xf32>
    %11 = vector.extract_strided_slice %2 {offsets = [2, 0], sizes = [1, 8], strides = [1, 1]} : vector<3x8xf32> to vector<1x8xf32>
    %cst_7 = arith.constant dense<0.000000e+00> : vector<8xf32>
    %12 = vector.multi_reduction <add>, %9, %cst_7 [0] : vector<16x8xf32> to vector<8xf32>
    %13 = vector.shape_cast %12 : vector<8xf32> to vector<1x8xf32>
    %cst_8 = arith.constant 1.600000e+01 : f32
    %14 = vector.broadcast %cst_8 : f32 to vector<1x8xf32>
    %15 = arith.divf %13, %14 : vector<1x8xf32>
    %16 = vector.broadcast %15 : vector<1x8xf32> to vector<16x8xf32>
    %17 = arith.subf %9, %16 : vector<16x8xf32>
    %18 = arith.mulf %17, %17 : vector<16x8xf32>
    %cst_9 = arith.constant dense<0.000000e+00> : vector<8xf32>
    %19 = vector.multi_reduction <add>, %18, %cst_9 [0] : vector<16x8xf32> to vector<8xf32>
    %20 = vector.shape_cast %19 : vector<8xf32> to vector<1x8xf32>
    %cst_10 = arith.constant 1.600000e+01 : f32
    %21 = vector.broadcast %cst_10 : f32 to vector<1x8xf32>
    %22 = arith.divf %20, %21 : vector<1x8xf32>
    %cst_11 = arith.constant 9.99999974E-6 : f32
    %23 = vector.broadcast %cst_11 : f32 to vector<1x8xf32>
    %24 = arith.addf %22, %23 : vector<1x8xf32>
    %25 = math.rsqrt %24 : vector<1x8xf32>
    %26 = vector.broadcast %25 : vector<1x8xf32> to vector<16x8xf32>
    %27 = arith.mulf %17, %26 : vector<16x8xf32>
    %28 = vector.broadcast %10 : vector<1x8xf32> to vector<16x8xf32>
    %29 = arith.mulf %27, %28 : vector<16x8xf32>
    %30 = vector.broadcast %11 : vector<1x8xf32> to vector<16x8xf32>
    %31 = arith.addf %29, %30 : vector<16x8xf32>
    %cst_12 = arith.constant 0.000000e+00 : f32
    %32 = vector.broadcast %cst_12 : f32 to vector<16x8xf32>
    %33 = arith.maximumf %31, %32 : vector<16x8xf32>
    %c0_13 = arith.constant 0 : index
    %c0_14 = arith.constant 0 : index
    %c0_15 = arith.constant 0 : index
    %34 = vector.load %arg7[%c0_13, %c0_14, %c0_15] : memref<5x5x64xf32, #tpu.memory_space<vmem>>, vector<1x5x64xf32>
    %35 = vector.shape_cast %34 : vector<1x5x64xf32> to vector<5x64xf32>
    %c0_16 = arith.constant 0 : index
    %c0_17 = arith.constant 0 : index
    %36 = vector.load %arg5[%c0_16, %c0_17] : memref<8x64xbf16, #tpu.memory_space<vmem>>, vector<8x64xbf16>
    %37 = vector.extract_strided_slice %35 {offsets = [0, 0], sizes = [1, 64], strides = [1, 1]} : vector<5x64xf32> to vector<1x64xf32>
    %38 = vector.extract_strided_slice %35 {offsets = [1, 0], sizes = [1, 64], strides = [1, 1]} : vector<5x64xf32> to vector<1x64xf32>
    %39 = vector.extract_strided_slice %35 {offsets = [2, 0], sizes = [1, 64], strides = [1, 1]} : vector<5x64xf32> to vector<1x64xf32>
    %40 = arith.truncf %33 : vector<16x8xf32> to vector<16x8xbf16>
    %cst_18 = arith.constant dense<0.000000e+00> : vector<16x64xf32>
    %41 = tpu.matmul %40, %36, %cst_18 {dimension_numbers = #tpu.dot_dimension_numbers<[1], [0], [0], [1], [0, 0, 1, 1], [], []>} : vector<16x8xbf16>, vector<8x64xbf16>, vector<16x64xf32> -> vector<16x64xf32>
    %42 = vector.extract_strided_slice %41 {offsets = [0, 0], sizes = [16, 32], strides = [1, 1]} : vector<16x64xf32> to vector<16x32xf32>
    %43 = vector.extract_strided_slice %38 {offsets = [0, 0], sizes = [1, 32], strides = [1, 1]} : vector<1x64xf32> to vector<1x32xf32>
    %44 = vector.broadcast %43 : vector<1x32xf32> to vector<16x32xf32>
    %45 = arith.mulf %42, %44 : vector<16x32xf32>
    %cst_19 = arith.constant dense<0.000000e+00> : vector<16xf32>
    %46 = vector.multi_reduction <add>, %45, %cst_19 [1] : vector<16x32xf32> to vector<16xf32>
    %47 = vector.shape_cast %46 : vector<16xf32> to vector<16x1xf32>
    %48 = vector.extract_strided_slice %37 {offsets = [0, 0], sizes = [1, 32], strides = [1, 1]} : vector<1x64xf32> to vector<1x32xf32>
    %cst_20 = arith.constant dense<0.000000e+00> : vector<1x16xf32>
    %49 = tpu.matmul %48, %42, %cst_20 {dimension_numbers = #tpu.dot_dimension_numbers<[1], [1], [0], [0], [0, 0, 1, 0], [], []>} : vector<1x32xf32>, vector<16x32xf32>, vector<1x16xf32> -> vector<1x16xf32>
    %50 = vector.broadcast %47 : vector<16x1xf32> to vector<16x16xf32>
    %51 = vector.broadcast %49 : vector<1x16xf32> to vector<16x16xf32>
    %52 = arith.addf %50, %51 : vector<16x16xf32>
    %cst_21 = arith.constant 2.000000e-01 : f32
    %53 = vector.broadcast %cst_21 : f32 to vector<16x16xf32>
    %54 = arith.mulf %53, %52 : vector<16x16xf32>
    %55 = arith.maximumf %52, %54 : vector<16x16xf32>
    %cst_22 = arith.constant dense<0xFF800000> : vector<16xf32>
    %56 = vector.multi_reduction <maximumf>, %55, %cst_22 [1] : vector<16x16xf32> to vector<16xf32>
    %57 = vector.shape_cast %56 : vector<16xf32> to vector<16x1xf32>
    %58 = vector.broadcast %57 : vector<16x1xf32> to vector<16x16xf32>
    %59 = arith.subf %55, %58 : vector<16x16xf32>
    %60 = math.exp %59 : vector<16x16xf32>
    %61 = arith.mulf %1, %60 : vector<16x16xf32>
    %cst_23 = arith.constant dense<0.000000e+00> : vector<16xf32>
    %62 = vector.multi_reduction <add>, %61, %cst_23 [1] : vector<16x16xf32> to vector<16xf32>
    %63 = vector.shape_cast %62 : vector<16xf32> to vector<16x1xf32>
    %64 = tpu.reciprocal %63 {approx = true} : vector<16x1xf32> -> vector<16x1xf32>
    %65 = vector.broadcast %64 : vector<16x1xf32> to vector<16x16xf32>
    %66 = arith.mulf %61, %65 : vector<16x16xf32>
    %67 = arith.truncf %66 : vector<16x16xf32> to vector<16x16xbf16>
    %68 = arith.truncf %42 : vector<16x32xf32> to vector<16x32xbf16>
    %cst_24 = arith.constant dense<0.000000e+00> : vector<16x32xf32>
    %69 = tpu.matmul %67, %68, %cst_24 {dimension_numbers = #tpu.dot_dimension_numbers<[1], [0], [0], [1], [0, 0, 1, 1], [], []>} : vector<16x16xbf16>, vector<16x32xbf16>, vector<16x32xf32> -> vector<16x32xf32>
    %70 = vector.extract_strided_slice %41 {offsets = [0, 32], sizes = [16, 32], strides = [1, 1]} : vector<16x64xf32> to vector<16x32xf32>
    %71 = vector.extract_strided_slice %38 {offsets = [0, 32], sizes = [1, 32], strides = [1, 1]} : vector<1x64xf32> to vector<1x32xf32>
    %72 = vector.broadcast %71 : vector<1x32xf32> to vector<16x32xf32>
    %73 = arith.mulf %70, %72 : vector<16x32xf32>
    %cst_25 = arith.constant dense<0.000000e+00> : vector<16xf32>
    %74 = vector.multi_reduction <add>, %73, %cst_25 [1] : vector<16x32xf32> to vector<16xf32>
    %75 = vector.shape_cast %74 : vector<16xf32> to vector<16x1xf32>
    %76 = vector.extract_strided_slice %37 {offsets = [0, 32], sizes = [1, 32], strides = [1, 1]} : vector<1x64xf32> to vector<1x32xf32>
    %cst_26 = arith.constant dense<0.000000e+00> : vector<1x16xf32>
    %77 = tpu.matmul %76, %70, %cst_26 {dimension_numbers = #tpu.dot_dimension_numbers<[1], [1], [0], [0], [0, 0, 1, 0], [], []>} : vector<1x32xf32>, vector<16x32xf32>, vector<1x16xf32> -> vector<1x16xf32>
    %78 = vector.broadcast %75 : vector<16x1xf32> to vector<16x16xf32>
    %79 = vector.broadcast %77 : vector<1x16xf32> to vector<16x16xf32>
    %80 = arith.addf %78, %79 : vector<16x16xf32>
    %cst_27 = arith.constant 2.000000e-01 : f32
    %81 = vector.broadcast %cst_27 : f32 to vector<16x16xf32>
    %82 = arith.mulf %81, %80 : vector<16x16xf32>
    %83 = arith.maximumf %80, %82 : vector<16x16xf32>
    %cst_28 = arith.constant dense<0xFF800000> : vector<16xf32>
    %84 = vector.multi_reduction <maximumf>, %83, %cst_28 [1] : vector<16x16xf32> to vector<16xf32>
    %85 = vector.shape_cast %84 : vector<16xf32> to vector<16x1xf32>
    %86 = vector.broadcast %85 : vector<16x1xf32> to vector<16x16xf32>
    %87 = arith.subf %83, %86 : vector<16x16xf32>
    %88 = math.exp %87 : vector<16x16xf32>
    %89 = arith.mulf %1, %88 : vector<16x16xf32>
    %cst_29 = arith.constant dense<0.000000e+00> : vector<16xf32>
    %90 = vector.multi_reduction <add>, %89, %cst_29 [1] : vector<16x16xf32> to vector<16xf32>
    %91 = vector.shape_cast %90 : vector<16xf32> to vector<16x1xf32>
    %92 = tpu.reciprocal %91 {approx = true} : vector<16x1xf32> -> vector<16x1xf32>
    %93 = vector.broadcast %92 : vector<16x1xf32> to vector<16x16xf32>
    %94 = arith.mulf %89, %93 : vector<16x16xf32>
    %95 = arith.truncf %94 : vector<16x16xf32> to vector<16x16xbf16>
    %96 = arith.truncf %70 : vector<16x32xf32> to vector<16x32xbf16>
    %cst_30 = arith.constant dense<0.000000e+00> : vector<16x32xf32>
    %97 = tpu.matmul %95, %96, %cst_30 {dimension_numbers = #tpu.dot_dimension_numbers<[1], [0], [0], [1], [0, 0, 1, 1], [], []>} : vector<16x16xbf16>, vector<16x32xbf16>, vector<16x32xf32> -> vector<16x32xf32>
    %98 = tpu.concatenate %69, %97 in 1 : vector<16x32xf32>, vector<16x32xf32> -> vector<16x64xf32>
    %99 = vector.broadcast %39 : vector<1x64xf32> to vector<16x64xf32>
    %100 = arith.addf %98, %99 : vector<16x64xf32>
    %101 = vector.extract_strided_slice %35 {offsets = [3, 0], sizes = [1, 64], strides = [1, 1]} : vector<5x64xf32> to vector<1x64xf32>
    %102 = vector.extract_strided_slice %35 {offsets = [4, 0], sizes = [1, 64], strides = [1, 1]} : vector<5x64xf32> to vector<1x64xf32>
    %cst_31 = arith.constant dense<0.000000e+00> : vector<64xf32>
    %103 = vector.multi_reduction <add>, %100, %cst_31 [0] : vector<16x64xf32> to vector<64xf32>
    %104 = vector.shape_cast %103 : vector<64xf32> to vector<1x64xf32>
    %cst_32 = arith.constant 1.600000e+01 : f32
    %105 = vector.broadcast %cst_32 : f32 to vector<1x64xf32>
    %106 = arith.divf %104, %105 : vector<1x64xf32>
    %107 = vector.broadcast %106 : vector<1x64xf32> to vector<16x64xf32>
    %108 = arith.subf %100, %107 : vector<16x64xf32>
    %109 = arith.mulf %108, %108 : vector<16x64xf32>
    %cst_33 = arith.constant dense<0.000000e+00> : vector<64xf32>
    %110 = vector.multi_reduction <add>, %109, %cst_33 [0] : vector<16x64xf32> to vector<64xf32>
    %111 = vector.shape_cast %110 : vector<64xf32> to vector<1x64xf32>
    %cst_34 = arith.constant 1.600000e+01 : f32
    %112 = vector.broadcast %cst_34 : f32 to vector<1x64xf32>
    %113 = arith.divf %111, %112 : vector<1x64xf32>
    %cst_35 = arith.constant 9.99999974E-6 : f32
    %114 = vector.broadcast %cst_35 : f32 to vector<1x64xf32>
    %115 = arith.addf %113, %114 : vector<1x64xf32>
    %116 = math.rsqrt %115 : vector<1x64xf32>
    %117 = vector.broadcast %116 : vector<1x64xf32> to vector<16x64xf32>
    %118 = arith.mulf %108, %117 : vector<16x64xf32>
    %119 = vector.broadcast %101 : vector<1x64xf32> to vector<16x64xf32>
    %120 = arith.mulf %118, %119 : vector<16x64xf32>
    %121 = vector.broadcast %102 : vector<1x64xf32> to vector<16x64xf32>
    %122 = arith.addf %120, %121 : vector<16x64xf32>
    %cst_36 = arith.constant 0.000000e+00 : f32
    %123 = vector.broadcast %cst_36 : f32 to vector<16x64xf32>
    %124 = arith.maximumf %122, %123 : vector<16x64xf32>
    %c1 = arith.constant 1 : index
    %c0_37 = arith.constant 0 : index
    %c0_38 = arith.constant 0 : index
    %125 = vector.load %arg7[%c1, %c0_37, %c0_38] : memref<5x5x64xf32, #tpu.memory_space<vmem>>, vector<1x5x64xf32>
    %126 = vector.shape_cast %125 : vector<1x5x64xf32> to vector<5x64xf32>
    %c0_39 = arith.constant 0 : index
    %c0_40 = arith.constant 0 : index
    %c0_41 = arith.constant 0 : index
    %127 = vector.load %arg6[%c0_39, %c0_40, %c0_41] : memref<4x64x64xbf16, #tpu.memory_space<vmem>>, vector<1x64x64xbf16>
    %128 = vector.shape_cast %127 : vector<1x64x64xbf16> to vector<64x64xbf16>
    %129 = vector.extract_strided_slice %126 {offsets = [0, 0], sizes = [1, 64], strides = [1, 1]} : vector<5x64xf32> to vector<1x64xf32>
    %130 = vector.extract_strided_slice %126 {offsets = [1, 0], sizes = [1, 64], strides = [1, 1]} : vector<5x64xf32> to vector<1x64xf32>
    %131 = vector.extract_strided_slice %126 {offsets = [2, 0], sizes = [1, 64], strides = [1, 1]} : vector<5x64xf32> to vector<1x64xf32>
    %132 = arith.truncf %124 : vector<16x64xf32> to vector<16x64xbf16>
    %cst_42 = arith.constant dense<0.000000e+00> : vector<16x64xf32>
    %133 = tpu.matmul %132, %128, %cst_42 {dimension_numbers = #tpu.dot_dimension_numbers<[1], [0], [0], [1], [0, 0, 1, 1], [], []>} : vector<16x64xbf16>, vector<64x64xbf16>, vector<16x64xf32> -> vector<16x64xf32>
    %134 = vector.extract_strided_slice %133 {offsets = [0, 0], sizes = [16, 32], strides = [1, 1]} : vector<16x64xf32> to vector<16x32xf32>
    %135 = vector.extract_strided_slice %130 {offsets = [0, 0], sizes = [1, 32], strides = [1, 1]} : vector<1x64xf32> to vector<1x32xf32>
    %136 = vector.broadcast %135 : vector<1x32xf32> to vector<16x32xf32>
    %137 = arith.mulf %134, %136 : vector<16x32xf32>
    %cst_43 = arith.constant dense<0.000000e+00> : vector<16xf32>
    %138 = vector.multi_reduction <add>, %137, %cst_43 [1] : vector<16x32xf32> to vector<16xf32>
    %139 = vector.shape_cast %138 : vector<16xf32> to vector<16x1xf32>
    %140 = vector.extract_strided_slice %129 {offsets = [0, 0], sizes = [1, 32], strides = [1, 1]} : vector<1x64xf32> to vector<1x32xf32>
    %cst_44 = arith.constant dense<0.000000e+00> : vector<1x16xf32>
    %141 = tpu.matmul %140, %134, %cst_44 {dimension_numbers = #tpu.dot_dimension_numbers<[1], [1], [0], [0], [0, 0, 1, 0], [], []>} : vector<1x32xf32>, vector<16x32xf32>, vector<1x16xf32> -> vector<1x16xf32>
    %142 = vector.broadcast %139 : vector<16x1xf32> to vector<16x16xf32>
    %143 = vector.broadcast %141 : vector<1x16xf32> to vector<16x16xf32>
    %144 = arith.addf %142, %143 : vector<16x16xf32>
    %cst_45 = arith.constant 2.000000e-01 : f32
    %145 = vector.broadcast %cst_45 : f32 to vector<16x16xf32>
    %146 = arith.mulf %145, %144 : vector<16x16xf32>
    %147 = arith.maximumf %144, %146 : vector<16x16xf32>
    %cst_46 = arith.constant dense<0xFF800000> : vector<16xf32>
    %148 = vector.multi_reduction <maximumf>, %147, %cst_46 [1] : vector<16x16xf32> to vector<16xf32>
    %149 = vector.shape_cast %148 : vector<16xf32> to vector<16x1xf32>
    %150 = vector.broadcast %149 : vector<16x1xf32> to vector<16x16xf32>
    %151 = arith.subf %147, %150 : vector<16x16xf32>
    %152 = math.exp %151 : vector<16x16xf32>
    %153 = arith.mulf %1, %152 : vector<16x16xf32>
    %cst_47 = arith.constant dense<0.000000e+00> : vector<16xf32>
    %154 = vector.multi_reduction <add>, %153, %cst_47 [1] : vector<16x16xf32> to vector<16xf32>
    %155 = vector.shape_cast %154 : vector<16xf32> to vector<16x1xf32>
    %156 = tpu.reciprocal %155 {approx = true} : vector<16x1xf32> -> vector<16x1xf32>
    %157 = vector.broadcast %156 : vector<16x1xf32> to vector<16x16xf32>
    %158 = arith.mulf %153, %157 : vector<16x16xf32>
    %159 = arith.truncf %158 : vector<16x16xf32> to vector<16x16xbf16>
    %160 = arith.truncf %134 : vector<16x32xf32> to vector<16x32xbf16>
    %cst_48 = arith.constant dense<0.000000e+00> : vector<16x32xf32>
    %161 = tpu.matmul %159, %160, %cst_48 {dimension_numbers = #tpu.dot_dimension_numbers<[1], [0], [0], [1], [0, 0, 1, 1], [], []>} : vector<16x16xbf16>, vector<16x32xbf16>, vector<16x32xf32> -> vector<16x32xf32>
    %162 = vector.extract_strided_slice %133 {offsets = [0, 32], sizes = [16, 32], strides = [1, 1]} : vector<16x64xf32> to vector<16x32xf32>
    %163 = vector.extract_strided_slice %130 {offsets = [0, 32], sizes = [1, 32], strides = [1, 1]} : vector<1x64xf32> to vector<1x32xf32>
    %164 = vector.broadcast %163 : vector<1x32xf32> to vector<16x32xf32>
    %165 = arith.mulf %162, %164 : vector<16x32xf32>
    %cst_49 = arith.constant dense<0.000000e+00> : vector<16xf32>
    %166 = vector.multi_reduction <add>, %165, %cst_49 [1] : vector<16x32xf32> to vector<16xf32>
    %167 = vector.shape_cast %166 : vector<16xf32> to vector<16x1xf32>
    %168 = vector.extract_strided_slice %129 {offsets = [0, 32], sizes = [1, 32], strides = [1, 1]} : vector<1x64xf32> to vector<1x32xf32>
    %cst_50 = arith.constant dense<0.000000e+00> : vector<1x16xf32>
    %169 = tpu.matmul %168, %162, %cst_50 {dimension_numbers = #tpu.dot_dimension_numbers<[1], [1], [0], [0], [0, 0, 1, 0], [], []>} : vector<1x32xf32>, vector<16x32xf32>, vector<1x16xf32> -> vector<1x16xf32>
    %170 = vector.broadcast %167 : vector<16x1xf32> to vector<16x16xf32>
    %171 = vector.broadcast %169 : vector<1x16xf32> to vector<16x16xf32>
    %172 = arith.addf %170, %171 : vector<16x16xf32>
    %cst_51 = arith.constant 2.000000e-01 : f32
    %173 = vector.broadcast %cst_51 : f32 to vector<16x16xf32>
    %174 = arith.mulf %173, %172 : vector<16x16xf32>
    %175 = arith.maximumf %172, %174 : vector<16x16xf32>
    %cst_52 = arith.constant dense<0xFF800000> : vector<16xf32>
    %176 = vector.multi_reduction <maximumf>, %175, %cst_52 [1] : vector<16x16xf32> to vector<16xf32>
    %177 = vector.shape_cast %176 : vector<16xf32> to vector<16x1xf32>
    %178 = vector.broadcast %177 : vector<16x1xf32> to vector<16x16xf32>
    %179 = arith.subf %175, %178 : vector<16x16xf32>
    %180 = math.exp %179 : vector<16x16xf32>
    %181 = arith.mulf %1, %180 : vector<16x16xf32>
    %cst_53 = arith.constant dense<0.000000e+00> : vector<16xf32>
    %182 = vector.multi_reduction <add>, %181, %cst_53 [1] : vector<16x16xf32> to vector<16xf32>
    %183 = vector.shape_cast %182 : vector<16xf32> to vector<16x1xf32>
    %184 = tpu.reciprocal %183 {approx = true} : vector<16x1xf32> -> vector<16x1xf32>
    %185 = vector.broadcast %184 : vector<16x1xf32> to vector<16x16xf32>
    %186 = arith.mulf %181, %185 : vector<16x16xf32>
    %187 = arith.truncf %186 : vector<16x16xf32> to vector<16x16xbf16>
    %188 = arith.truncf %162 : vector<16x32xf32> to vector<16x32xbf16>
    %cst_54 = arith.constant dense<0.000000e+00> : vector<16x32xf32>
    %189 = tpu.matmul %187, %188, %cst_54 {dimension_numbers = #tpu.dot_dimension_numbers<[1], [0], [0], [1], [0, 0, 1, 1], [], []>} : vector<16x16xbf16>, vector<16x32xbf16>, vector<16x32xf32> -> vector<16x32xf32>
    %190 = tpu.concatenate %161, %189 in 1 : vector<16x32xf32>, vector<16x32xf32> -> vector<16x64xf32>
    %191 = vector.broadcast %131 : vector<1x64xf32> to vector<16x64xf32>
    %192 = arith.addf %190, %191 : vector<16x64xf32>
    %193 = vector.extract_strided_slice %126 {offsets = [3, 0], sizes = [1, 64], strides = [1, 1]} : vector<5x64xf32> to vector<1x64xf32>
    %194 = vector.extract_strided_slice %126 {offsets = [4, 0], sizes = [1, 64], strides = [1, 1]} : vector<5x64xf32> to vector<1x64xf32>
    %cst_55 = arith.constant dense<0.000000e+00> : vector<64xf32>
    %195 = vector.multi_reduction <add>, %192, %cst_55 [0] : vector<16x64xf32> to vector<64xf32>
    %196 = vector.shape_cast %195 : vector<64xf32> to vector<1x64xf32>
    %cst_56 = arith.constant 1.600000e+01 : f32
    %197 = vector.broadcast %cst_56 : f32 to vector<1x64xf32>
    %198 = arith.divf %196, %197 : vector<1x64xf32>
    %199 = vector.broadcast %198 : vector<1x64xf32> to vector<16x64xf32>
    %200 = arith.subf %192, %199 : vector<16x64xf32>
    %201 = arith.mulf %200, %200 : vector<16x64xf32>
    %cst_57 = arith.constant dense<0.000000e+00> : vector<64xf32>
    %202 = vector.multi_reduction <add>, %201, %cst_57 [0] : vector<16x64xf32> to vector<64xf32>
    %203 = vector.shape_cast %202 : vector<64xf32> to vector<1x64xf32>
    %cst_58 = arith.constant 1.600000e+01 : f32
    %204 = vector.broadcast %cst_58 : f32 to vector<1x64xf32>
    %205 = arith.divf %203, %204 : vector<1x64xf32>
    %cst_59 = arith.constant 9.99999974E-6 : f32
    %206 = vector.broadcast %cst_59 : f32 to vector<1x64xf32>
    %207 = arith.addf %205, %206 : vector<1x64xf32>
    %208 = math.rsqrt %207 : vector<1x64xf32>
    %209 = vector.broadcast %208 : vector<1x64xf32> to vector<16x64xf32>
    %210 = arith.mulf %200, %209 : vector<16x64xf32>
    %211 = vector.broadcast %193 : vector<1x64xf32> to vector<16x64xf32>
    %212 = arith.mulf %210, %211 : vector<16x64xf32>
    %213 = vector.broadcast %194 : vector<1x64xf32> to vector<16x64xf32>
    %214 = arith.addf %212, %213 : vector<16x64xf32>
    %cst_60 = arith.constant 0.000000e+00 : f32
    %215 = vector.broadcast %cst_60 : f32 to vector<16x64xf32>
    %216 = arith.maximumf %214, %215 : vector<16x64xf32>
    %c2 = arith.constant 2 : index
    %c0_61 = arith.constant 0 : index
    %c0_62 = arith.constant 0 : index
    %217 = vector.load %arg7[%c2, %c0_61, %c0_62] : memref<5x5x64xf32, #tpu.memory_space<vmem>>, vector<1x5x64xf32>
    %218 = vector.shape_cast %217 : vector<1x5x64xf32> to vector<5x64xf32>
    %c1_63 = arith.constant 1 : index
    %c0_64 = arith.constant 0 : index
    %c0_65 = arith.constant 0 : index
    %219 = vector.load %arg6[%c1_63, %c0_64, %c0_65] : memref<4x64x64xbf16, #tpu.memory_space<vmem>>, vector<1x64x64xbf16>
    %220 = vector.shape_cast %219 : vector<1x64x64xbf16> to vector<64x64xbf16>
    %221 = vector.extract_strided_slice %218 {offsets = [0, 0], sizes = [1, 64], strides = [1, 1]} : vector<5x64xf32> to vector<1x64xf32>
    %222 = vector.extract_strided_slice %218 {offsets = [1, 0], sizes = [1, 64], strides = [1, 1]} : vector<5x64xf32> to vector<1x64xf32>
    %223 = vector.extract_strided_slice %218 {offsets = [2, 0], sizes = [1, 64], strides = [1, 1]} : vector<5x64xf32> to vector<1x64xf32>
    %224 = arith.truncf %216 : vector<16x64xf32> to vector<16x64xbf16>
    %cst_66 = arith.constant dense<0.000000e+00> : vector<16x64xf32>
    %225 = tpu.matmul %224, %220, %cst_66 {dimension_numbers = #tpu.dot_dimension_numbers<[1], [0], [0], [1], [0, 0, 1, 1], [], []>} : vector<16x64xbf16>, vector<64x64xbf16>, vector<16x64xf32> -> vector<16x64xf32>
    %226 = vector.extract_strided_slice %225 {offsets = [0, 0], sizes = [16, 32], strides = [1, 1]} : vector<16x64xf32> to vector<16x32xf32>
    %227 = vector.extract_strided_slice %222 {offsets = [0, 0], sizes = [1, 32], strides = [1, 1]} : vector<1x64xf32> to vector<1x32xf32>
    %228 = vector.broadcast %227 : vector<1x32xf32> to vector<16x32xf32>
    %229 = arith.mulf %226, %228 : vector<16x32xf32>
    %cst_67 = arith.constant dense<0.000000e+00> : vector<16xf32>
    %230 = vector.multi_reduction <add>, %229, %cst_67 [1] : vector<16x32xf32> to vector<16xf32>
    %231 = vector.shape_cast %230 : vector<16xf32> to vector<16x1xf32>
    %232 = vector.extract_strided_slice %221 {offsets = [0, 0], sizes = [1, 32], strides = [1, 1]} : vector<1x64xf32> to vector<1x32xf32>
    %cst_68 = arith.constant dense<0.000000e+00> : vector<1x16xf32>
    %233 = tpu.matmul %232, %226, %cst_68 {dimension_numbers = #tpu.dot_dimension_numbers<[1], [1], [0], [0], [0, 0, 1, 0], [], []>} : vector<1x32xf32>, vector<16x32xf32>, vector<1x16xf32> -> vector<1x16xf32>
    %234 = vector.broadcast %231 : vector<16x1xf32> to vector<16x16xf32>
    %235 = vector.broadcast %233 : vector<1x16xf32> to vector<16x16xf32>
    %236 = arith.addf %234, %235 : vector<16x16xf32>
    %cst_69 = arith.constant 2.000000e-01 : f32
    %237 = vector.broadcast %cst_69 : f32 to vector<16x16xf32>
    %238 = arith.mulf %237, %236 : vector<16x16xf32>
    %239 = arith.maximumf %236, %238 : vector<16x16xf32>
    %cst_70 = arith.constant dense<0xFF800000> : vector<16xf32>
    %240 = vector.multi_reduction <maximumf>, %239, %cst_70 [1] : vector<16x16xf32> to vector<16xf32>
    %241 = vector.shape_cast %240 : vector<16xf32> to vector<16x1xf32>
    %242 = vector.broadcast %241 : vector<16x1xf32> to vector<16x16xf32>
    %243 = arith.subf %239, %242 : vector<16x16xf32>
    %244 = math.exp %243 : vector<16x16xf32>
    %245 = arith.mulf %1, %244 : vector<16x16xf32>
    %cst_71 = arith.constant dense<0.000000e+00> : vector<16xf32>
    %246 = vector.multi_reduction <add>, %245, %cst_71 [1] : vector<16x16xf32> to vector<16xf32>
    %247 = vector.shape_cast %246 : vector<16xf32> to vector<16x1xf32>
    %248 = tpu.reciprocal %247 {approx = true} : vector<16x1xf32> -> vector<16x1xf32>
    %249 = vector.broadcast %248 : vector<16x1xf32> to vector<16x16xf32>
    %250 = arith.mulf %245, %249 : vector<16x16xf32>
    %251 = arith.truncf %250 : vector<16x16xf32> to vector<16x16xbf16>
    %252 = arith.truncf %226 : vector<16x32xf32> to vector<16x32xbf16>
    %cst_72 = arith.constant dense<0.000000e+00> : vector<16x32xf32>
    %253 = tpu.matmul %251, %252, %cst_72 {dimension_numbers = #tpu.dot_dimension_numbers<[1], [0], [0], [1], [0, 0, 1, 1], [], []>} : vector<16x16xbf16>, vector<16x32xbf16>, vector<16x32xf32> -> vector<16x32xf32>
    %254 = vector.extract_strided_slice %225 {offsets = [0, 32], sizes = [16, 32], strides = [1, 1]} : vector<16x64xf32> to vector<16x32xf32>
    %255 = vector.extract_strided_slice %222 {offsets = [0, 32], sizes = [1, 32], strides = [1, 1]} : vector<1x64xf32> to vector<1x32xf32>
    %256 = vector.broadcast %255 : vector<1x32xf32> to vector<16x32xf32>
    %257 = arith.mulf %254, %256 : vector<16x32xf32>
    %cst_73 = arith.constant dense<0.000000e+00> : vector<16xf32>
    %258 = vector.multi_reduction <add>, %257, %cst_73 [1] : vector<16x32xf32> to vector<16xf32>
    %259 = vector.shape_cast %258 : vector<16xf32> to vector<16x1xf32>
    %260 = vector.extract_strided_slice %221 {offsets = [0, 32], sizes = [1, 32], strides = [1, 1]} : vector<1x64xf32> to vector<1x32xf32>
    %cst_74 = arith.constant dense<0.000000e+00> : vector<1x16xf32>
    %261 = tpu.matmul %260, %254, %cst_74 {dimension_numbers = #tpu.dot_dimension_numbers<[1], [1], [0], [0], [0, 0, 1, 0], [], []>} : vector<1x32xf32>, vector<16x32xf32>, vector<1x16xf32> -> vector<1x16xf32>
    %262 = vector.broadcast %259 : vector<16x1xf32> to vector<16x16xf32>
    %263 = vector.broadcast %261 : vector<1x16xf32> to vector<16x16xf32>
    %264 = arith.addf %262, %263 : vector<16x16xf32>
    %cst_75 = arith.constant 2.000000e-01 : f32
    %265 = vector.broadcast %cst_75 : f32 to vector<16x16xf32>
    %266 = arith.mulf %265, %264 : vector<16x16xf32>
    %267 = arith.maximumf %264, %266 : vector<16x16xf32>
    %cst_76 = arith.constant dense<0xFF800000> : vector<16xf32>
    %268 = vector.multi_reduction <maximumf>, %267, %cst_76 [1] : vector<16x16xf32> to vector<16xf32>
    %269 = vector.shape_cast %268 : vector<16xf32> to vector<16x1xf32>
    %270 = vector.broadcast %269 : vector<16x1xf32> to vector<16x16xf32>
    %271 = arith.subf %267, %270 : vector<16x16xf32>
    %272 = math.exp %271 : vector<16x16xf32>
    %273 = arith.mulf %1, %272 : vector<16x16xf32>
    %cst_77 = arith.constant dense<0.000000e+00> : vector<16xf32>
    %274 = vector.multi_reduction <add>, %273, %cst_77 [1] : vector<16x16xf32> to vector<16xf32>
    %275 = vector.shape_cast %274 : vector<16xf32> to vector<16x1xf32>
    %276 = tpu.reciprocal %275 {approx = true} : vector<16x1xf32> -> vector<16x1xf32>
    %277 = vector.broadcast %276 : vector<16x1xf32> to vector<16x16xf32>
    %278 = arith.mulf %273, %277 : vector<16x16xf32>
    %279 = arith.truncf %278 : vector<16x16xf32> to vector<16x16xbf16>
    %280 = arith.truncf %254 : vector<16x32xf32> to vector<16x32xbf16>
    %cst_78 = arith.constant dense<0.000000e+00> : vector<16x32xf32>
    %281 = tpu.matmul %279, %280, %cst_78 {dimension_numbers = #tpu.dot_dimension_numbers<[1], [0], [0], [1], [0, 0, 1, 1], [], []>} : vector<16x16xbf16>, vector<16x32xbf16>, vector<16x32xf32> -> vector<16x32xf32>
    %282 = tpu.concatenate %253, %281 in 1 : vector<16x32xf32>, vector<16x32xf32> -> vector<16x64xf32>
    %283 = vector.broadcast %223 : vector<1x64xf32> to vector<16x64xf32>
    %284 = arith.addf %282, %283 : vector<16x64xf32>
    %285 = vector.extract_strided_slice %218 {offsets = [3, 0], sizes = [1, 64], strides = [1, 1]} : vector<5x64xf32> to vector<1x64xf32>
    %286 = vector.extract_strided_slice %218 {offsets = [4, 0], sizes = [1, 64], strides = [1, 1]} : vector<5x64xf32> to vector<1x64xf32>
    %cst_79 = arith.constant dense<0.000000e+00> : vector<64xf32>
    %287 = vector.multi_reduction <add>, %284, %cst_79 [0] : vector<16x64xf32> to vector<64xf32>
    %288 = vector.shape_cast %287 : vector<64xf32> to vector<1x64xf32>
    %cst_80 = arith.constant 1.600000e+01 : f32
    %289 = vector.broadcast %cst_80 : f32 to vector<1x64xf32>
    %290 = arith.divf %288, %289 : vector<1x64xf32>
    %291 = vector.broadcast %290 : vector<1x64xf32> to vector<16x64xf32>
    %292 = arith.subf %284, %291 : vector<16x64xf32>
    %293 = arith.mulf %292, %292 : vector<16x64xf32>
    %cst_81 = arith.constant dense<0.000000e+00> : vector<64xf32>
    %294 = vector.multi_reduction <add>, %293, %cst_81 [0] : vector<16x64xf32> to vector<64xf32>
    %295 = vector.shape_cast %294 : vector<64xf32> to vector<1x64xf32>
    %cst_82 = arith.constant 1.600000e+01 : f32
    %296 = vector.broadcast %cst_82 : f32 to vector<1x64xf32>
    %297 = arith.divf %295, %296 : vector<1x64xf32>
    %cst_83 = arith.constant 9.99999974E-6 : f32
    %298 = vector.broadcast %cst_83 : f32 to vector<1x64xf32>
    %299 = arith.addf %297, %298 : vector<1x64xf32>
    %300 = math.rsqrt %299 : vector<1x64xf32>
    %301 = vector.broadcast %300 : vector<1x64xf32> to vector<16x64xf32>
    %302 = arith.mulf %292, %301 : vector<16x64xf32>
    %303 = vector.broadcast %285 : vector<1x64xf32> to vector<16x64xf32>
    %304 = arith.mulf %302, %303 : vector<16x64xf32>
    %305 = vector.broadcast %286 : vector<1x64xf32> to vector<16x64xf32>
    %306 = arith.addf %304, %305 : vector<16x64xf32>
    %cst_84 = arith.constant 0.000000e+00 : f32
    %307 = vector.broadcast %cst_84 : f32 to vector<16x64xf32>
    %308 = arith.maximumf %306, %307 : vector<16x64xf32>
    %c3 = arith.constant 3 : index
    %c0_85 = arith.constant 0 : index
    %c0_86 = arith.constant 0 : index
    %309 = vector.load %arg7[%c3, %c0_85, %c0_86] : memref<5x5x64xf32, #tpu.memory_space<vmem>>, vector<1x5x64xf32>
    %310 = vector.shape_cast %309 : vector<1x5x64xf32> to vector<5x64xf32>
    %c2_87 = arith.constant 2 : index
    %c0_88 = arith.constant 0 : index
    %c0_89 = arith.constant 0 : index
    %311 = vector.load %arg6[%c2_87, %c0_88, %c0_89] : memref<4x64x64xbf16, #tpu.memory_space<vmem>>, vector<1x64x64xbf16>
    %312 = vector.shape_cast %311 : vector<1x64x64xbf16> to vector<64x64xbf16>
    %313 = vector.extract_strided_slice %310 {offsets = [0, 0], sizes = [1, 64], strides = [1, 1]} : vector<5x64xf32> to vector<1x64xf32>
    %314 = vector.extract_strided_slice %310 {offsets = [1, 0], sizes = [1, 64], strides = [1, 1]} : vector<5x64xf32> to vector<1x64xf32>
    %315 = vector.extract_strided_slice %310 {offsets = [2, 0], sizes = [1, 64], strides = [1, 1]} : vector<5x64xf32> to vector<1x64xf32>
    %316 = arith.truncf %308 : vector<16x64xf32> to vector<16x64xbf16>
    %cst_90 = arith.constant dense<0.000000e+00> : vector<16x64xf32>
    %317 = tpu.matmul %316, %312, %cst_90 {dimension_numbers = #tpu.dot_dimension_numbers<[1], [0], [0], [1], [0, 0, 1, 1], [], []>} : vector<16x64xbf16>, vector<64x64xbf16>, vector<16x64xf32> -> vector<16x64xf32>
    %318 = vector.extract_strided_slice %317 {offsets = [0, 0], sizes = [16, 32], strides = [1, 1]} : vector<16x64xf32> to vector<16x32xf32>
    %319 = vector.extract_strided_slice %314 {offsets = [0, 0], sizes = [1, 32], strides = [1, 1]} : vector<1x64xf32> to vector<1x32xf32>
    %320 = vector.broadcast %319 : vector<1x32xf32> to vector<16x32xf32>
    %321 = arith.mulf %318, %320 : vector<16x32xf32>
    %cst_91 = arith.constant dense<0.000000e+00> : vector<16xf32>
    %322 = vector.multi_reduction <add>, %321, %cst_91 [1] : vector<16x32xf32> to vector<16xf32>
    %323 = vector.shape_cast %322 : vector<16xf32> to vector<16x1xf32>
    %324 = vector.extract_strided_slice %313 {offsets = [0, 0], sizes = [1, 32], strides = [1, 1]} : vector<1x64xf32> to vector<1x32xf32>
    %cst_92 = arith.constant dense<0.000000e+00> : vector<1x16xf32>
    %325 = tpu.matmul %324, %318, %cst_92 {dimension_numbers = #tpu.dot_dimension_numbers<[1], [1], [0], [0], [0, 0, 1, 0], [], []>} : vector<1x32xf32>, vector<16x32xf32>, vector<1x16xf32> -> vector<1x16xf32>
    %326 = vector.broadcast %323 : vector<16x1xf32> to vector<16x16xf32>
    %327 = vector.broadcast %325 : vector<1x16xf32> to vector<16x16xf32>
    %328 = arith.addf %326, %327 : vector<16x16xf32>
    %cst_93 = arith.constant 2.000000e-01 : f32
    %329 = vector.broadcast %cst_93 : f32 to vector<16x16xf32>
    %330 = arith.mulf %329, %328 : vector<16x16xf32>
    %331 = arith.maximumf %328, %330 : vector<16x16xf32>
    %cst_94 = arith.constant dense<0xFF800000> : vector<16xf32>
    %332 = vector.multi_reduction <maximumf>, %331, %cst_94 [1] : vector<16x16xf32> to vector<16xf32>
    %333 = vector.shape_cast %332 : vector<16xf32> to vector<16x1xf32>
    %334 = vector.broadcast %333 : vector<16x1xf32> to vector<16x16xf32>
    %335 = arith.subf %331, %334 : vector<16x16xf32>
    %336 = math.exp %335 : vector<16x16xf32>
    %337 = arith.mulf %1, %336 : vector<16x16xf32>
    %cst_95 = arith.constant dense<0.000000e+00> : vector<16xf32>
    %338 = vector.multi_reduction <add>, %337, %cst_95 [1] : vector<16x16xf32> to vector<16xf32>
    %339 = vector.shape_cast %338 : vector<16xf32> to vector<16x1xf32>
    %340 = tpu.reciprocal %339 {approx = true} : vector<16x1xf32> -> vector<16x1xf32>
    %341 = vector.broadcast %340 : vector<16x1xf32> to vector<16x16xf32>
    %342 = arith.mulf %337, %341 : vector<16x16xf32>
    %343 = arith.truncf %342 : vector<16x16xf32> to vector<16x16xbf16>
    %344 = arith.truncf %318 : vector<16x32xf32> to vector<16x32xbf16>
    %cst_96 = arith.constant dense<0.000000e+00> : vector<16x32xf32>
    %345 = tpu.matmul %343, %344, %cst_96 {dimension_numbers = #tpu.dot_dimension_numbers<[1], [0], [0], [1], [0, 0, 1, 1], [], []>} : vector<16x16xbf16>, vector<16x32xbf16>, vector<16x32xf32> -> vector<16x32xf32>
    %346 = vector.extract_strided_slice %317 {offsets = [0, 32], sizes = [16, 32], strides = [1, 1]} : vector<16x64xf32> to vector<16x32xf32>
    %347 = vector.extract_strided_slice %314 {offsets = [0, 32], sizes = [1, 32], strides = [1, 1]} : vector<1x64xf32> to vector<1x32xf32>
    %348 = vector.broadcast %347 : vector<1x32xf32> to vector<16x32xf32>
    %349 = arith.mulf %346, %348 : vector<16x32xf32>
    %cst_97 = arith.constant dense<0.000000e+00> : vector<16xf32>
    %350 = vector.multi_reduction <add>, %349, %cst_97 [1] : vector<16x32xf32> to vector<16xf32>
    %351 = vector.shape_cast %350 : vector<16xf32> to vector<16x1xf32>
    %352 = vector.extract_strided_slice %313 {offsets = [0, 32], sizes = [1, 32], strides = [1, 1]} : vector<1x64xf32> to vector<1x32xf32>
    %cst_98 = arith.constant dense<0.000000e+00> : vector<1x16xf32>
    %353 = tpu.matmul %352, %346, %cst_98 {dimension_numbers = #tpu.dot_dimension_numbers<[1], [1], [0], [0], [0, 0, 1, 0], [], []>} : vector<1x32xf32>, vector<16x32xf32>, vector<1x16xf32> -> vector<1x16xf32>
    %354 = vector.broadcast %351 : vector<16x1xf32> to vector<16x16xf32>
    %355 = vector.broadcast %353 : vector<1x16xf32> to vector<16x16xf32>
    %356 = arith.addf %354, %355 : vector<16x16xf32>
    %cst_99 = arith.constant 2.000000e-01 : f32
    %357 = vector.broadcast %cst_99 : f32 to vector<16x16xf32>
    %358 = arith.mulf %357, %356 : vector<16x16xf32>
    %359 = arith.maximumf %356, %358 : vector<16x16xf32>
    %cst_100 = arith.constant dense<0xFF800000> : vector<16xf32>
    %360 = vector.multi_reduction <maximumf>, %359, %cst_100 [1] : vector<16x16xf32> to vector<16xf32>
    %361 = vector.shape_cast %360 : vector<16xf32> to vector<16x1xf32>
    %362 = vector.broadcast %361 : vector<16x1xf32> to vector<16x16xf32>
    %363 = arith.subf %359, %362 : vector<16x16xf32>
    %364 = math.exp %363 : vector<16x16xf32>
    %365 = arith.mulf %1, %364 : vector<16x16xf32>
    %cst_101 = arith.constant dense<0.000000e+00> : vector<16xf32>
    %366 = vector.multi_reduction <add>, %365, %cst_101 [1] : vector<16x16xf32> to vector<16xf32>
    %367 = vector.shape_cast %366 : vector<16xf32> to vector<16x1xf32>
    %368 = tpu.reciprocal %367 {approx = true} : vector<16x1xf32> -> vector<16x1xf32>
    %369 = vector.broadcast %368 : vector<16x1xf32> to vector<16x16xf32>
    %370 = arith.mulf %365, %369 : vector<16x16xf32>
    %371 = arith.truncf %370 : vector<16x16xf32> to vector<16x16xbf16>
    %372 = arith.truncf %346 : vector<16x32xf32> to vector<16x32xbf16>
    %cst_102 = arith.constant dense<0.000000e+00> : vector<16x32xf32>
    %373 = tpu.matmul %371, %372, %cst_102 {dimension_numbers = #tpu.dot_dimension_numbers<[1], [0], [0], [1], [0, 0, 1, 1], [], []>} : vector<16x16xbf16>, vector<16x32xbf16>, vector<16x32xf32> -> vector<16x32xf32>
    %374 = tpu.concatenate %345, %373 in 1 : vector<16x32xf32>, vector<16x32xf32> -> vector<16x64xf32>
    %375 = vector.broadcast %315 : vector<1x64xf32> to vector<16x64xf32>
    %376 = arith.addf %374, %375 : vector<16x64xf32>
    %377 = vector.extract_strided_slice %310 {offsets = [3, 0], sizes = [1, 64], strides = [1, 1]} : vector<5x64xf32> to vector<1x64xf32>
    %378 = vector.extract_strided_slice %310 {offsets = [4, 0], sizes = [1, 64], strides = [1, 1]} : vector<5x64xf32> to vector<1x64xf32>
    %cst_103 = arith.constant dense<0.000000e+00> : vector<64xf32>
    %379 = vector.multi_reduction <add>, %376, %cst_103 [0] : vector<16x64xf32> to vector<64xf32>
    %380 = vector.shape_cast %379 : vector<64xf32> to vector<1x64xf32>
    %cst_104 = arith.constant 1.600000e+01 : f32
    %381 = vector.broadcast %cst_104 : f32 to vector<1x64xf32>
    %382 = arith.divf %380, %381 : vector<1x64xf32>
    %383 = vector.broadcast %382 : vector<1x64xf32> to vector<16x64xf32>
    %384 = arith.subf %376, %383 : vector<16x64xf32>
    %385 = arith.mulf %384, %384 : vector<16x64xf32>
    %cst_105 = arith.constant dense<0.000000e+00> : vector<64xf32>
    %386 = vector.multi_reduction <add>, %385, %cst_105 [0] : vector<16x64xf32> to vector<64xf32>
    %387 = vector.shape_cast %386 : vector<64xf32> to vector<1x64xf32>
    %cst_106 = arith.constant 1.600000e+01 : f32
    %388 = vector.broadcast %cst_106 : f32 to vector<1x64xf32>
    %389 = arith.divf %387, %388 : vector<1x64xf32>
    %cst_107 = arith.constant 9.99999974E-6 : f32
    %390 = vector.broadcast %cst_107 : f32 to vector<1x64xf32>
    %391 = arith.addf %389, %390 : vector<1x64xf32>
    %392 = math.rsqrt %391 : vector<1x64xf32>
    %393 = vector.broadcast %392 : vector<1x64xf32> to vector<16x64xf32>
    %394 = arith.mulf %384, %393 : vector<16x64xf32>
    %395 = vector.broadcast %377 : vector<1x64xf32> to vector<16x64xf32>
    %396 = arith.mulf %394, %395 : vector<16x64xf32>
    %397 = vector.broadcast %378 : vector<1x64xf32> to vector<16x64xf32>
    %398 = arith.addf %396, %397 : vector<16x64xf32>
    %cst_108 = arith.constant 0.000000e+00 : f32
    %399 = vector.broadcast %cst_108 : f32 to vector<16x64xf32>
    %400 = arith.maximumf %398, %399 : vector<16x64xf32>
    %c4 = arith.constant 4 : index
    %c0_109 = arith.constant 0 : index
    %c0_110 = arith.constant 0 : index
    %401 = vector.load %arg7[%c4, %c0_109, %c0_110] : memref<5x5x64xf32, #tpu.memory_space<vmem>>, vector<1x5x64xf32>
    %402 = vector.shape_cast %401 : vector<1x5x64xf32> to vector<5x64xf32>
    %c3_111 = arith.constant 3 : index
    %c0_112 = arith.constant 0 : index
    %c0_113 = arith.constant 0 : index
    %403 = vector.load %arg6[%c3_111, %c0_112, %c0_113] : memref<4x64x64xbf16, #tpu.memory_space<vmem>>, vector<1x64x64xbf16>
    %404 = vector.shape_cast %403 : vector<1x64x64xbf16> to vector<64x64xbf16>
    %405 = vector.extract_strided_slice %402 {offsets = [0, 0], sizes = [1, 64], strides = [1, 1]} : vector<5x64xf32> to vector<1x64xf32>
    %406 = vector.extract_strided_slice %402 {offsets = [1, 0], sizes = [1, 64], strides = [1, 1]} : vector<5x64xf32> to vector<1x64xf32>
    %407 = vector.extract_strided_slice %402 {offsets = [2, 0], sizes = [1, 64], strides = [1, 1]} : vector<5x64xf32> to vector<1x64xf32>
    %408 = arith.truncf %400 : vector<16x64xf32> to vector<16x64xbf16>
    %cst_114 = arith.constant dense<0.000000e+00> : vector<16x64xf32>
    %409 = tpu.matmul %408, %404, %cst_114 {dimension_numbers = #tpu.dot_dimension_numbers<[1], [0], [0], [1], [0, 0, 1, 1], [], []>} : vector<16x64xbf16>, vector<64x64xbf16>, vector<16x64xf32> -> vector<16x64xf32>
    %410 = vector.extract_strided_slice %409 {offsets = [0, 0], sizes = [16, 32], strides = [1, 1]} : vector<16x64xf32> to vector<16x32xf32>
    %411 = vector.extract_strided_slice %406 {offsets = [0, 0], sizes = [1, 32], strides = [1, 1]} : vector<1x64xf32> to vector<1x32xf32>
    %412 = vector.broadcast %411 : vector<1x32xf32> to vector<16x32xf32>
    %413 = arith.mulf %410, %412 : vector<16x32xf32>
    %cst_115 = arith.constant dense<0.000000e+00> : vector<16xf32>
    %414 = vector.multi_reduction <add>, %413, %cst_115 [1] : vector<16x32xf32> to vector<16xf32>
    %415 = vector.shape_cast %414 : vector<16xf32> to vector<16x1xf32>
    %416 = vector.extract_strided_slice %405 {offsets = [0, 0], sizes = [1, 32], strides = [1, 1]} : vector<1x64xf32> to vector<1x32xf32>
    %cst_116 = arith.constant dense<0.000000e+00> : vector<1x16xf32>
    %417 = tpu.matmul %416, %410, %cst_116 {dimension_numbers = #tpu.dot_dimension_numbers<[1], [1], [0], [0], [0, 0, 1, 0], [], []>} : vector<1x32xf32>, vector<16x32xf32>, vector<1x16xf32> -> vector<1x16xf32>
    %418 = vector.broadcast %415 : vector<16x1xf32> to vector<16x16xf32>
    %419 = vector.broadcast %417 : vector<1x16xf32> to vector<16x16xf32>
    %420 = arith.addf %418, %419 : vector<16x16xf32>
    %cst_117 = arith.constant 2.000000e-01 : f32
    %421 = vector.broadcast %cst_117 : f32 to vector<16x16xf32>
    %422 = arith.mulf %421, %420 : vector<16x16xf32>
    %423 = arith.maximumf %420, %422 : vector<16x16xf32>
    %cst_118 = arith.constant dense<0xFF800000> : vector<16xf32>
    %424 = vector.multi_reduction <maximumf>, %423, %cst_118 [1] : vector<16x16xf32> to vector<16xf32>
    %425 = vector.shape_cast %424 : vector<16xf32> to vector<16x1xf32>
    %426 = vector.broadcast %425 : vector<16x1xf32> to vector<16x16xf32>
    %427 = arith.subf %423, %426 : vector<16x16xf32>
    %428 = math.exp %427 : vector<16x16xf32>
    %429 = arith.mulf %1, %428 : vector<16x16xf32>
    %cst_119 = arith.constant dense<0.000000e+00> : vector<16xf32>
    %430 = vector.multi_reduction <add>, %429, %cst_119 [1] : vector<16x16xf32> to vector<16xf32>
    %431 = vector.shape_cast %430 : vector<16xf32> to vector<16x1xf32>
    %432 = tpu.reciprocal %431 {approx = true} : vector<16x1xf32> -> vector<16x1xf32>
    %433 = vector.broadcast %432 : vector<16x1xf32> to vector<16x16xf32>
    %434 = arith.mulf %429, %433 : vector<16x16xf32>
    %435 = arith.truncf %434 : vector<16x16xf32> to vector<16x16xbf16>
    %436 = arith.truncf %410 : vector<16x32xf32> to vector<16x32xbf16>
    %cst_120 = arith.constant dense<0.000000e+00> : vector<16x32xf32>
    %437 = tpu.matmul %435, %436, %cst_120 {dimension_numbers = #tpu.dot_dimension_numbers<[1], [0], [0], [1], [0, 0, 1, 1], [], []>} : vector<16x16xbf16>, vector<16x32xbf16>, vector<16x32xf32> -> vector<16x32xf32>
    %438 = vector.extract_strided_slice %409 {offsets = [0, 32], sizes = [16, 32], strides = [1, 1]} : vector<16x64xf32> to vector<16x32xf32>
    %439 = vector.extract_strided_slice %406 {offsets = [0, 32], sizes = [1, 32], strides = [1, 1]} : vector<1x64xf32> to vector<1x32xf32>
    %440 = vector.broadcast %439 : vector<1x32xf32> to vector<16x32xf32>
    %441 = arith.mulf %438, %440 : vector<16x32xf32>
    %cst_121 = arith.constant dense<0.000000e+00> : vector<16xf32>
    %442 = vector.multi_reduction <add>, %441, %cst_121 [1] : vector<16x32xf32> to vector<16xf32>
    %443 = vector.shape_cast %442 : vector<16xf32> to vector<16x1xf32>
    %444 = vector.extract_strided_slice %405 {offsets = [0, 32], sizes = [1, 32], strides = [1, 1]} : vector<1x64xf32> to vector<1x32xf32>
    %cst_122 = arith.constant dense<0.000000e+00> : vector<1x16xf32>
    %445 = tpu.matmul %444, %438, %cst_122 {dimension_numbers = #tpu.dot_dimension_numbers<[1], [1], [0], [0], [0, 0, 1, 0], [], []>} : vector<1x32xf32>, vector<16x32xf32>, vector<1x16xf32> -> vector<1x16xf32>
    %446 = vector.broadcast %443 : vector<16x1xf32> to vector<16x16xf32>
    %447 = vector.broadcast %445 : vector<1x16xf32> to vector<16x16xf32>
    %448 = arith.addf %446, %447 : vector<16x16xf32>
    %cst_123 = arith.constant 2.000000e-01 : f32
    %449 = vector.broadcast %cst_123 : f32 to vector<16x16xf32>
    %450 = arith.mulf %449, %448 : vector<16x16xf32>
    %451 = arith.maximumf %448, %450 : vector<16x16xf32>
    %cst_124 = arith.constant dense<0xFF800000> : vector<16xf32>
    %452 = vector.multi_reduction <maximumf>, %451, %cst_124 [1] : vector<16x16xf32> to vector<16xf32>
    %453 = vector.shape_cast %452 : vector<16xf32> to vector<16x1xf32>
    %454 = vector.broadcast %453 : vector<16x1xf32> to vector<16x16xf32>
    %455 = arith.subf %451, %454 : vector<16x16xf32>
    %456 = math.exp %455 : vector<16x16xf32>
    %457 = arith.mulf %1, %456 : vector<16x16xf32>
    %cst_125 = arith.constant dense<0.000000e+00> : vector<16xf32>
    %458 = vector.multi_reduction <add>, %457, %cst_125 [1] : vector<16x16xf32> to vector<16xf32>
    %459 = vector.shape_cast %458 : vector<16xf32> to vector<16x1xf32>
    %460 = tpu.reciprocal %459 {approx = true} : vector<16x1xf32> -> vector<16x1xf32>
    %461 = vector.broadcast %460 : vector<16x1xf32> to vector<16x16xf32>
    %462 = arith.mulf %457, %461 : vector<16x16xf32>
    %463 = arith.truncf %462 : vector<16x16xf32> to vector<16x16xbf16>
    %464 = arith.truncf %438 : vector<16x32xf32> to vector<16x32xbf16>
    %cst_126 = arith.constant dense<0.000000e+00> : vector<16x32xf32>
    %465 = tpu.matmul %463, %464, %cst_126 {dimension_numbers = #tpu.dot_dimension_numbers<[1], [0], [0], [1], [0, 0, 1, 1], [], []>} : vector<16x16xbf16>, vector<16x32xbf16>, vector<16x32xf32> -> vector<16x32xf32>
    %466 = tpu.concatenate %437, %465 in 1 : vector<16x32xf32>, vector<16x32xf32> -> vector<16x64xf32>
    %467 = vector.broadcast %407 : vector<1x64xf32> to vector<16x64xf32>
    %468 = arith.addf %466, %467 : vector<16x64xf32>
    %469 = vector.extract_strided_slice %402 {offsets = [3, 0], sizes = [1, 64], strides = [1, 1]} : vector<5x64xf32> to vector<1x64xf32>
    %470 = vector.extract_strided_slice %402 {offsets = [4, 0], sizes = [1, 64], strides = [1, 1]} : vector<5x64xf32> to vector<1x64xf32>
    %cst_127 = arith.constant dense<0.000000e+00> : vector<64xf32>
    %471 = vector.multi_reduction <add>, %468, %cst_127 [0] : vector<16x64xf32> to vector<64xf32>
    %472 = vector.shape_cast %471 : vector<64xf32> to vector<1x64xf32>
    %cst_128 = arith.constant 1.600000e+01 : f32
    %473 = vector.broadcast %cst_128 : f32 to vector<1x64xf32>
    %474 = arith.divf %472, %473 : vector<1x64xf32>
    %475 = vector.broadcast %474 : vector<1x64xf32> to vector<16x64xf32>
    %476 = arith.subf %468, %475 : vector<16x64xf32>
    %477 = arith.mulf %476, %476 : vector<16x64xf32>
    %cst_129 = arith.constant dense<0.000000e+00> : vector<64xf32>
    %478 = vector.multi_reduction <add>, %477, %cst_129 [0] : vector<16x64xf32> to vector<64xf32>
    %479 = vector.shape_cast %478 : vector<64xf32> to vector<1x64xf32>
    %cst_130 = arith.constant 1.600000e+01 : f32
    %480 = vector.broadcast %cst_130 : f32 to vector<1x64xf32>
    %481 = arith.divf %479, %480 : vector<1x64xf32>
    %cst_131 = arith.constant 9.99999974E-6 : f32
    %482 = vector.broadcast %cst_131 : f32 to vector<1x64xf32>
    %483 = arith.addf %481, %482 : vector<1x64xf32>
    %484 = math.rsqrt %483 : vector<1x64xf32>
    %485 = vector.broadcast %484 : vector<1x64xf32> to vector<16x64xf32>
    %486 = arith.mulf %476, %485 : vector<16x64xf32>
    %487 = vector.broadcast %469 : vector<1x64xf32> to vector<16x64xf32>
    %488 = arith.mulf %486, %487 : vector<16x64xf32>
    %489 = vector.broadcast %470 : vector<1x64xf32> to vector<16x64xf32>
    %490 = arith.addf %488, %489 : vector<16x64xf32>
    %cst_132 = arith.constant 0.000000e+00 : f32
    %491 = vector.broadcast %cst_132 : f32 to vector<16x64xf32>
    %492 = arith.maximumf %490, %491 : vector<16x64xf32>
    %c0_133 = arith.constant 0 : index
    %c0_134 = arith.constant 0 : index
    %493 = vector.load %arg1[%c0_133, %c0_134] : memref<2x16xbf16, #tpu.memory_space<vmem>>, vector<2x16xbf16>
    %494 = arith.truncf %492 : vector<16x64xf32> to vector<16x64xbf16>
    %cst_135 = arith.constant dense<0.000000e+00> : vector<2x64xf32>
    %495 = tpu.matmul %493, %494, %cst_135 {dimension_numbers = #tpu.dot_dimension_numbers<[1], [0], [0], [1], [0, 0, 1, 1], [], []>} : vector<2x16xbf16>, vector<16x64xbf16>, vector<2x64xf32> -> vector<2x64xf32>
    %496 = arith.truncf %495 : vector<2x64xf32> to vector<2x64xbf16>
    %c0_136 = arith.constant 0 : index
    %c0_137 = arith.constant 0 : index
    %497 = vector.load %arg8[%c0_136, %c0_137] : memref<64x3xbf16, #tpu.memory_space<vmem>>, vector<64x3xbf16>
    %cst_138 = arith.constant dense<0.000000e+00> : vector<2x3xf32>
    %498 = tpu.matmul %496, %497, %cst_138 {dimension_numbers = #tpu.dot_dimension_numbers<[1], [0], [0], [1], [0, 0, 1, 1], [], []>} : vector<2x64xbf16>, vector<64x3xbf16>, vector<2x3xf32> -> vector<2x3xf32>
    %c0_139 = arith.constant 0 : index
    %c0_140 = arith.constant 0 : index
    %499 = vector.load %arg9[%c0_139, %c0_140] : memref<1x3xf32, #tpu.memory_space<vmem>>, vector<1x3xf32>
    %500 = vector.broadcast %499 : vector<1x3xf32> to vector<2x3xf32>
    %501 = arith.addf %498, %500 : vector<2x3xf32>
    %c0_141 = arith.constant 0 : index
    %c0_142 = arith.constant 0 : index
    %502 = vector.load %arg10[%c0_141, %c0_142] : memref<2x3xf32, #tpu.memory_space<vmem>>, vector<2x3xf32>
    tpu.vector_store %arg10[%c0_141, %c0_142], %501 {strides = array<i32>} : memref<2x3xf32, #tpu.memory_space<vmem>>, vector<2x3xf32>,
    return
  }
}

</mosaic_0001>

<bundles_post_ra>
// kernel: tpu_custom_call.1
= control target key start
LH: loop header
LB: loop body
LE: loop exit
PB: predicated region body
PF: predicated region fallthrough
CT: control target
= control target key end

     0   :  { %15 = vsyncpa [#allocation3], 0  ;;  %s2428_s0 = inlined_call_operand.vmem [shape: bf16[16,16], index: 0, kind: input, shape index: {}]   ;;  %s2429_s1 = inlined_call_operand.hbm [shape: bf16[2,16], index: 1, kind: input, shape index: {}]   ;;  %s2430_s2 = inlined_call_operand.vmem [shape: f32[16,8], index: 2, kind: input, shape index: {}]   ;;  %s2431_s3 = inlined_call_operand.vmem [shape: bf16[8,8], index: 3, kind: input, shape index: {}]   ;;  %s2432_s4 = inlined_call_operand.vmem [shape: f32[3,8], index: 4, kind: input, shape index: {}]   ;;  %s2433_s5 = inlined_call_operand.vmem [shape: bf16[8,64], index: 5, kind: input, shape index: {}]   ;;  %s2434_s6 = inlined_call_operand.hbm [shape: bf16[4,64,64], index: 6, kind: input, shape index: {}]   ;;  %s2435_s7 = inlined_call_operand.vmem [shape: f32[5,5,64], index: 7, kind: input, shape index: {}]   ;;  %s2436_s8 = inlined_call_operand.vmem [shape: bf16[64,3], index: 8, kind: input, shape index: {}]   ;;  %s2437_s9 = inlined_call_operand.vmem [shape: f32[1,3], index: 9, kind: input, shape index: {}]   ;;  %s2438_s10 = inlined_call_operand.hbm [shape: f32[2,3], index: 10, kind: output, shape index: {}]  }
   0x1   :  { %16 = vsyncpa [#allocation6], 0 }
   0x2   :  { %17 = vsyncpa [#allocation4], 0  ;;  %s25_s15 = sshll.u32 %s2429_s1, 4  ;;  %s2041_s16 = smov [#allocation2]   ;;  %s26_s15 = int_to_ptr.hbm [resolvable:$true] %s25_s15 }
   0x3   :  { %s27_s17 = sshll.u32 %s2041_s16, 4  ;;  %s43_s20 = sshll.u32 %s2434_s6, 4  ;;  %s28_s17 = int_to_ptr.vmem [resolvable:$true] %s27_s17  ;;  %s44_s20 = int_to_ptr.hbm [resolvable:$true] %s43_s20 }
   0x4   :  { %30 = dma.hbm_to_vmem [thread:$0]  %s26_s15, 16, %s28_s17, [#allocation3]  }
   0x5   :  { %s2042_s21 = smov [#allocation5]   ;;  %s2043_s23 = smov 64  }
   0x6   :  { %s45_s22 = sshll.u32 %s2042_s21, 4  ;;  %s2044_s24 = smov 4   ;;  %s46_s22 = int_to_ptr.vmem [resolvable:$true] %s45_s22 }
   0x7   :  { %51 = dma.hbm_to_vmem [thread:$0]  %s44_s20, 2048, %s46_s22, [#allocation6], %s2043_s23, %s2043_s23, %s2044_s24  }
   0x8   :  { %2035 = dma.done.wait [#allocation3], 16  }
   0x9   :  { %2036 = vsyncadd [#allocation3], 4294967280 }
   0xa   :  { %2037 = dma.done.wait [#allocation6], 2048  }
   0xb   :  { %2038 = vsyncadd [#allocation6], 4294965248  ;;  %vm81_vm0 = vcmask 1043456   ;;  %v75_v0 = vld [vmem:[%s2431_s3] sm:$0xf]  ;;  %v73_v2 = vld [vmem:[%s2430_s2 + $0x8] sm:$0xff] }
   0xc   :  { %v72_v1 = vld [vmem:[%s2430_s2] sm:$0xff]  ;;  %v83_v3 = vsel %vm81_vm0, %v75_v0, 0  ;;  %vm77_vm1 = vcmask 64512   ;;  %v2045_v5 = vmov 16.0   ;;  %s2046_s12 = smov 96   ;;  %vm177_vm6 = vcmask 261120  }
   0xd   :  { %v74_v4 = vpack.c.bf16 %v73_v2, %v72_v1  ;;  %92 = vmatpush.bf16.msra.mxu0 %v83_v3  ;;  %1869 = vrcp.f32 %v2045_v5  ;;  %v2124_v6 = vld [vmem:[%s2432_s4] sm:$0x7]  ;;  %vm220_vm7 = vcmask 130048   ;;  %vm376_vm8 = vcmask 523264   ;;  %s2048_s29 = smov [#allocation7]   ;;  %s1693_s4 = sshll.u32 %s2438_s10, 4  ;;  %s1694_s4 = int_to_ptr.hbm [resolvable:$true] %s1693_s4 }
   0xe   :  { %v76_v8 = vperm.slane %v2124_v6, 0  ;;  %v152_v38 = vld [vmem:[%s2433_s5] sm:$0xf]  ;;  %v143_v52 = vperm.slane %v2124_v6, 1  ;;  %v146_v54 = vperm.slane %v2124_v6, 2  ;;  %s1691_s30 = sshll.u32 %s2048_s29, 4  ;;  %s1692_s30 = int_to_ptr.vmem [resolvable:$true] %s1691_s30 }
   0xf   :  { %v158_v39 = vsel %vm81_vm0, %v152_v38, 0  ;;  %v2142_v44 = vld [vmem:[%s2435_s7] sm:$0x1f] }
  0x10   :  { %1704 = vmatmul.msk.bf16.vlgmr.msra.gmra.mxu0 %vm77_vm1, %v74_v4  ;;  %167 = vmatpush.bf16.msra.mxu1 %v158_v39  ;;  %v174_v0 = vperm.slane %v2142_v44, 1 }
  0x11   :  { %278 = vrot.lane.b32.xlu1 %v2142_v44, %s2046_s12 }
  0x13   :  { %v1870_v9 = vpop.eup %1869 }
  0x14   :  { %v109_v11 = vmul.f32 16.0, %v1870_v9  ;;  %vm113_vm2 = vweird.f32 %v1870_v9 }
  0x16   :  { %v110_v16 = vsub.f32 1.0, %v109_v11 }
  0x18   :  { %v111_v19 = vmul.f32 %v1870_v9, %v110_v16 }
  0x1a   :  { %v112_v22 = vadd.f32 %v1870_v9, %v111_v19 }
  0x1c   :  { %v2129_v25 = vsel %vm113_vm2, %v1870_v9, %v112_v22 }
  0x83   :  { %v279_v9 = vpop.permute.xlu1 %278 }
  0x8d   :  { %v94_v7 = vpop.f32.mrf.mxu0 }
  0x8e   :  { %v95_v10 = vadd.f32 %v94_v7, %v76_v8 }
  0x90   :  { %v99_v14 = vsel %vm77_vm1, %v95_v10, 0.0 }
  0x95   :  { %v96_v12 = vpop.f32.mrf.mxu0 }
  0x96   :  { %v97_v13 = vadd.f32 %v96_v12, %v76_v8 }
  0x98   :  { %v100_v15 = vsel %vm77_vm1, %v97_v13, 0.0 }
  0x99   :  { %v101_v17 = vadd.f32 %v100_v15, %v99_v14 }
  0x9b   :  { %v102_v18 = vrot.slane %v101_v17, 4 }
  0x9d   :  { %v103_v20 = vadd.f32 %v102_v18, %v101_v17 }
  0x9f   :  { %v104_v21 = vrot.slane %v103_v20, 2 }
  0xa1   :  { %v105_v23 = vadd.f32 %v104_v21, %v103_v20 }
  0xa3   :  { %v106_v24 = vrot.slane %v105_v23, 1 }
  0xa5   :  { %v107_v26 = vadd.f32 %v106_v24, %v105_v23 }
  0xa7   :  { %v115_v27 = vmul.f32 %v2129_v25, %v107_v26 }
  0xa9   :  { %v116_v28 = vsub.f32 %v95_v10, %v115_v27  ;;  %v117_v29 = vsub.f32 %v97_v13, %v115_v27 }
  0xab   :  { %v118_v30 = vmul.f32 %v116_v28, %v116_v28  ;;  %v119_v31 = vmul.f32 %v117_v29, %v117_v29 }
  0xad   :  { %v120_v32 = vsel %vm77_vm1, %v118_v30, 0.0  ;;  %v121_v33 = vsel %vm77_vm1, %v119_v31, 0.0 }
  0xae   :  { %v122_v34 = vadd.f32 %v121_v33, %v120_v32 }
  0xb0   :  { %v123_v35 = vrot.slane %v122_v34, 4 }
  0xb2   :  { %v124_v36 = vadd.f32 %v123_v35, %v122_v34 }
  0xb4   :  { %v125_v37 = vrot.slane %v124_v36, 2 }
  0xb6   :  { %v126_v40 = vadd.f32 %v125_v37, %v124_v36 }
  0xb8   :  { %v127_v41 = vrot.slane %v126_v40, 1 }
  0xba   :  { %v128_v42 = vadd.f32 %v127_v41, %v126_v40 }
  0xbc   :  { %v129_v43 = vmul.f32 %v128_v42, %v2129_v25 }
  0xbe   :  { %v130_v45 = vadd.f32 1e-05, %v129_v43 }
  0xc0   :  { %1871 = vrsqrt.f32 %v130_v45  ;;  %vm137_vm4 = vweird.f32 %v130_v45 }
  0xc6   :  { %v1872_v46 = vpop.eup %1871 }
  0xc7   :  { %v132_v47 = vmul.f32 %v1872_v46, %v130_v45  ;;  %vm138_vm3 = vweird.f32 %v1872_v46 }
  0xc8   :  { %vm139_vm5 = vmor %vm137_vm4, %vm138_vm3 }
  0xc9   :  { %v133_v48 = vmul.f32 %v1872_v46, %v132_v47 }
  0xcb   :  { %v134_v49 = vmul.f32 0.5, %v133_v48 }
  0xcd   :  { %v135_v50 = vsub.f32 1.5, %v134_v49 }
  0xcf   :  { %v136_v51 = vmul.f32 %v1872_v46, %v135_v50  ;;  %v1857_v50 = vld [vmem:[%s2428_s0] sm:$0xff]   ;;  %s2047_s0 = smov 32  }
  0xd1   :  { %v140_v53 = vsel %vm139_vm5, %v1872_v46, %v136_v51 }
  0xd2   :  { %v141_v55 = vmul.f32 %v140_v53, %v116_v28  ;;  %v142_v56 = vmul.f32 %v140_v53, %v117_v29 }
  0xd4   :  { %v145_v57 = vmul.f32 %v143_v52, %v142_v56  ;;  %v144_v58 = vmul.f32 %v143_v52, %v141_v55  ;;  %v2173_v52 = vunpack.c.h.bf16 %v1857_v50  ;;  %v2175_v56 = vunpack.c.l.bf16 %v1857_v50  ;;  %v1838_v50 = vld [vmem:[#allocation5 + $0x10] sm:$0xff] }
  0xd6   :  { %v147_v59 = vadd.f32 %v146_v54, %v144_v58  ;;  %v148_v60 = vadd.f32 %v146_v54, %v145_v57 }
  0xd8   :  { %v149_v61 = vmax.f32 %v147_v59, 0.0  ;;  %v150_v62 = vmax.f32 %v148_v60, 0.0 }
  0xda   :  { %v153_v63 = vpack.c.bf16 %v150_v62, %v149_v61 }
  0xdc   :  { %1705 = vmatmul.msk.bf16.vlgmr.msra.gmra.mxu1 %vm77_vm1, %v153_v63 }
 0x159   :  { %v169_v1 = vpop.f32.mrf.mxu1 }
 0x15a   :  { %v175_v2 = vmul.f32 %v174_v0, %v169_v1 }
 0x15c   :  { %266 = vrot.lane.b32.xlu1 %v175_v2, %s2046_s12  ;;  %v178_v6 = vsel %vm177_vm6, %v175_v2, 0.0 }
 0x161   :  { %v171_v3 = vpop.f32.mrf.mxu1 }
 0x162   :  { %282 = vrot.lane.b32.xlu0 %v171_v3, %s2046_s12  ;;  %1706 = vmatpush.xpose.msk.msra.mxu3 %vm177_vm6, %v171_v3  ;;  %v176_v4 = vmul.f32 %v174_v0, %v171_v3  ;;  %v246_v5 = vpack.c.bf16 %v171_v3, %v169_v1 }
 0x164   :  { %268 = vrot.lane.b32.xlu2 %v176_v4, %s2046_s12  ;;  %v181_v13 = vsel %vm177_vm6, %v176_v4, 0.0 }
 0x166   :  { %1707 = vmatpush.xpose.msk.msra.mxu3 %vm177_vm6, %v169_v1 }
 0x169   :  { %1708 = vmatmul.msk.f32.vlgmr.msra.gmra.mxu3 %vm177_vm6, %v2142_v44 }
 0x16a   :  { %257 = vmatpush.bf16.msrb.mxu3 %v246_v5  ;;  %280 = vrot.lane.b32.xlu0 %v169_v1, %s2046_s12 }
 0x186   :  { %179 = vadd.xlane.f32.xlu1 %v178_v6 }
 0x1be   :  { %v269_v7 = vpop.permute.xlu2 %268 }
 0x1bf   :  { %v275_v8 = vsel %vm177_vm6, %v269_v7, 0.0 }
 0x1c0   :  { %276 = vadd.xlane.f32.xlu0 %v275_v8 }
 0x1ce   :  { %v267_v10 = vpop.permute.xlu1 %266 }
 0x1cf   :  { %v272_v11 = vsel %vm177_vm6, %v267_v10, 0.0 }
 0x1d0   :  { %273 = vadd.xlane.f32.xlu2 %v272_v11 }
 0x1d4   :  { %v283_v12 = vpop.permute.xlu0 %282 }
 0x1d5   :  { %1710 = vmatpush.xpose.msk.msra.mxu2 %vm177_vm6, %v283_v12 }
 0x1d8   :  { %182 = vadd.xlane.f32.xlu2 %v181_v13 }
 0x1dc   :  { %v281_v14 = vpop.permute.xlu0 %280 }
 0x1dd   :  { %1711 = vmatpush.xpose.msk.msra.mxu2 %vm177_vm6, %v281_v14 }
 0x1e0   :  { %1712 = vmatmul.msk.f32.vlgmr.msra.gmra.mxu2 %vm177_vm6, %v279_v9 }
 0x1ec   :  { %v210_v15 = vpop.f32.mrf.mxu3 }
 0x1ed   :  { %v213_v16 = vperm.slane %v210_v15, 0 }
 0x1f9   :  { %v180_v17 = vpop.xlane.xlu1 %179 }
 0x1fa   :  { %v214_v18 = vadd.f32 %v213_v16, %v180_v17 }
 0x1fc   :  { %v216_v19 = vmul.f32 0.2, %v214_v18 }
 0x1fe   :  { %v218_v20 = vmax.f32 %v214_v18, %v216_v19 }
 0x200   :  { %v221_v21 = vsel %vm220_vm7, %v218_v20, -inf }
 0x201   :  { %222 = vmax.xlane.f32.xlu1 %v221_v21 }
 0x233   :  { %v277_v26 = vpop.xlane.xlu0 %276 }
 0x243   :  { %v274_v22 = vpop.xlane.xlu2 %273 }
 0x24b   :  { %v183_v27 = vpop.xlane.xlu2 %182 }
 0x24c   :  { %v215_v30 = vadd.f32 %v213_v16, %v183_v27 }
 0x24e   :  { %v217_v35 = vmul.f32 0.2, %v215_v30 }
 0x250   :  { %v219_v38 = vmax.f32 %v215_v30, %v217_v35 }
 0x252   :  { %v224_v39 = vsel %vm220_vm7, %v219_v38, -inf }
 0x263   :  { %v307_v23 = vpop.f32.mrf.mxu2 }
 0x264   :  { %v310_v24 = vperm.slane %v307_v23, 0  ;;  %v373_v23 = vperm.slane %v2142_v44, 2 }
 0x266   :  { %v311_v28 = vadd.f32 %v310_v24, %v274_v22  ;;  %v312_v29 = vadd.f32 %v310_v24, %v277_v26 }
 0x268   :  { %v314_v31 = vmul.f32 0.2, %v312_v29  ;;  %v313_v32 = vmul.f32 0.2, %v311_v28 }
 0x26a   :  { %v316_v33 = vmax.f32 %v312_v29, %v314_v31  ;;  %v315_v34 = vmax.f32 %v311_v28, %v313_v32 }
 0x26c   :  { %v320_v36 = vsel %vm220_vm7, %v316_v33, -inf  ;;  %v317_v37 = vsel %vm220_vm7, %v315_v34, -inf }
 0x26d   :  { %321 = vmax.xlane.f32.xlu0 %v320_v36  ;;  %318 = vmax.xlane.f32.xlu2 %v317_v37 }
 0x274   :  { %v223_v40 = vpop.xlane.xlu1 %222 }
 0x275   :  { %225 = vmax.xlane.f32.xlu2 %v224_v39  ;;  %v227_v46 = vsub.f32 %v218_v20, %v223_v40 }
 0x277   :  { %v229_v49 = vmul.f32 1.442695, %v227_v46  ;;  %v1839_v46 = vld [vmem:[#allocation5 + $0x18] sm:$0xff] }
 0x278   :  { %464 = vmatpush.bf16.msrb.mxu1 %v1839_v46 }
 0x27c   :  { %465 = vmatpush.bf16.msrb.mxu1 %v1838_v50 }
 0x28d   :  { %343 = vrot.lane.b32.xlu2 %v246_v5, %s2046_s12 }
 0x2e0   :  { %v322_v41 = vpop.xlane.xlu0 %321  ;;  %v319_v42 = vpop.xlane.xlu2 %318 }
 0x2e1   :  { %v324_v43 = vsub.f32 %v316_v33, %v322_v41  ;;  %v323_v45 = vsub.f32 %v315_v34, %v319_v42 }
 0x2e3   :  { %v327_v47 = vmul.f32 1.442695, %v324_v43  ;;  %v325_v48 = vmul.f32 1.442695, %v323_v45 }
 0x2e5   :  { %1873 = vpow2.f32 %v327_v47 }
 0x2e6   :  { %1875 = vpow2.f32 %v325_v48 }
 0x2e7   :  { %1877 = vpow2.f32 %v229_v49 }
 0x2e8   :  { %v226_v51 = vpop.xlane.xlu2 %225 }
 0x2e9   :  { %v228_v53 = vsub.f32 %v219_v38, %v226_v51 }
 0x2eb   :  { %v1874_v54 = vpop.eup %1873  ;;  %v231_v55 = vmul.f32 1.442695, %v228_v53 }
 0x2ec   :  { %v1876_v57 = vpop.eup %1875  ;;  %v330_v58 = vmul.f32 %v1874_v54, %v2173_v52  ;;  %v1837_v54 = vld [vmem:[#allocation5 + $0x8] sm:$0xff] }
 0x2ed   :  { %1879 = vpow2.f32 %v231_v55  ;;  %v329_v59 = vmul.f32 %v1876_v57, %v2175_v56  ;;  %v1878_v62 = vpop.eup %1877  ;;  %466 = vmatpush.bf16.msrb.mxu1 %v1837_v54  ;;  %v1836_v57 = vld [vmem:[#allocation5] sm:$0xff] }
 0x2ee   :  { %v334_v60 = vsel %vm220_vm7, %v330_v58, 0.0  ;;  %v233_v1 = vmul.f32 %v1878_v62, %v2175_v56 }
 0x2ef   :  { %335 = vadd.xlane.f32.xlu1 %v334_v60  ;;  %v331_v61 = vsel %vm220_vm7, %v329_v59, 0.0 }
 0x2f0   :  { %332 = vadd.xlane.f32.xlu0 %v331_v61  ;;  %v344_v63 = vpop.permute.xlu2 %343  ;;  %v235_v4 = vsel %vm220_vm7, %v233_v1, 0.0 }
 0x2f1   :  { %356 = vmatpush.bf16.msrb.mxu0 %v344_v63  ;;  %467 = vmatpush.bf16.msrb.mxu1 %v1836_v57 }
 0x2f3   :  { %v1880_v0 = vpop.eup %1879 }
 0x2f4   :  { %v234_v2 = vmul.f32 %v1880_v0, %v2173_v52 }
 0x2f6   :  { %v238_v3 = vsel %vm220_vm7, %v234_v2, 0.0 }
 0x2f7   :  { %239 = vadd.xlane.f32.xlu1 %v238_v3 }
 0x2f8   :  { %236 = vadd.xlane.f32.xlu0 %v235_v4 }
 0x362   :  { %v336_v5 = vpop.xlane.xlu1 %335 }
 0x363   :  { %1881 = vrcp.f32 %v336_v5  ;;  %v333_v6 = vpop.xlane.xlu0 %332  ;;  %v414_v5 = vperm.slane %v2142_v44, 3 }
 0x364   :  { %1883 = vrcp.f32 %v333_v6 }
 0x369   :  { %v1882_v7 = vpop.eup %1881 }
 0x36a   :  { %v1884_v8 = vpop.eup %1883  ;;  %v340_v9 = vmul.f32 %v1882_v7, %v330_v58  ;;  %v240_v10 = vpop.xlane.xlu1 %239 }
 0x36b   :  { %v339_v11 = vmul.f32 %v1884_v8, %v329_v59  ;;  %1885 = vrcp.f32 %v240_v10  ;;  %v237_v12 = vpop.xlane.xlu0 %236 }
 0x36c   :  { %1887 = vrcp.f32 %v237_v12 }
 0x36d   :  { %v341_v13 = vpack.c.bf16 %v340_v9, %v339_v11  ;;  %v417_v9 = vperm.slane %v2142_v44, 4 }
 0x36f   :  { %1713 = vmatmul.msk.bf16.vlgmr.msrb.gmra.mxu0 %vm220_vm7, %v341_v13 }
 0x371   :  { %v1886_v14 = vpop.eup %1885 }
 0x372   :  { %v1888_v15 = vpop.eup %1887  ;;  %v244_v16 = vmul.f32 %v1886_v14, %v234_v2 }
 0x373   :  { %v243_v17 = vmul.f32 %v1888_v15, %v233_v1 }
 0x375   :  { %v245_v18 = vpack.c.bf16 %v244_v16, %v243_v17  ;;  %v2204_v17 = vld [vmem:[%s2435_s7 + $0x8] sm:$0x1f] }
 0x377   :  { %1709 = vmatmul.msk.bf16.vlgmr.msrb.gmra.mxu3 %vm220_vm7, %v245_v18  ;;  %v474_v18 = vperm.slane %v2204_v17, 1 }
 0x3ec   :  { %v358_v19 = vpop.f32.mrf.mxu0 }
 0x3ed   :  { %365 = vrot.lane.b32.xlu0 %v358_v19, %s2047_s0 }
 0x3f4   :  { %v360_v20 = vpop.f32.mrf.mxu0 }
 0x3f5   :  { %367 = vrot.lane.b32.xlu1 %v360_v20, %s2047_s0 }
 0x3fa   :  { %v259_v21 = vpop.f32.mrf.mxu3 }
 0x402   :  { %v261_v26 = vpop.f32.mrf.mxu3 }
 0x45f   :  { %v366_v22 = vpop.permute.xlu0 %365 }
 0x460   :  { %v371_v24 = vsel %vm177_vm6, %v259_v21, %v366_v22 }
 0x461   :  { %v374_v27 = vadd.f32 %v373_v23, %v371_v24 }
 0x463   :  { %v377_v31 = vsel %vm376_vm8, %v374_v27, 0.0 }
 0x467   :  { %v368_v28 = vpop.permute.xlu1 %367 }
 0x468   :  { %v372_v29 = vsel %vm177_vm6, %v261_v26, %v368_v28 }
 0x469   :  { %v375_v30 = vadd.f32 %v373_v23, %v372_v29 }
 0x46b   :  { %v378_v32 = vsel %vm376_vm8, %v375_v30, 0.0 }
 0x46c   :  { %v379_v33 = vadd.f32 %v378_v32, %v377_v31 }
 0x46e   :  { %v380_v34 = vrot.slane %v379_v33, 4 }
 0x470   :  { %v381_v35 = vadd.f32 %v380_v34, %v379_v33 }
 0x472   :  { %v382_v36 = vrot.slane %v381_v35, 2 }
 0x474   :  { %v383_v37 = vadd.f32 %v382_v36, %v381_v35 }
 0x476   :  { %v384_v38 = vrot.slane %v383_v37, 1 }
 0x478   :  { %v385_v39 = vadd.f32 %v384_v38, %v383_v37 }
 0x47a   :  { %v386_v40 = vmul.f32 %v385_v39, %v2129_v25 }
 0x47c   :  { %v387_v41 = vsub.f32 %v374_v27, %v386_v40  ;;  %v388_v42 = vsub.f32 %v375_v30, %v386_v40 }
 0x47e   :  { %v389_v43 = vmul.f32 %v387_v41, %v387_v41  ;;  %v390_v45 = vmul.f32 %v388_v42, %v388_v42 }
 0x480   :  { %v391_v47 = vsel %vm376_vm8, %v389_v43, 0.0  ;;  %v392_v48 = vsel %vm376_vm8, %v390_v45, 0.0 }
 0x481   :  { %v393_v49 = vadd.f32 %v392_v48, %v391_v47 }
 0x483   :  { %v394_v51 = vrot.slane %v393_v49, 4 }
 0x485   :  { %v395_v53 = vadd.f32 %v394_v51, %v393_v49 }
 0x487   :  { %v396_v55 = vrot.slane %v395_v53, 2 }
 0x489   :  { %v397_v58 = vadd.f32 %v396_v55, %v395_v53 }
 0x48b   :  { %v398_v59 = vrot.slane %v397_v58, 1 }
 0x48d   :  { %v399_v60 = vadd.f32 %v398_v59, %v397_v58 }
 0x48f   :  { %v400_v61 = vmul.f32 %v399_v60, %v2129_v25 }
 0x491   :  { %v401_v62 = vadd.f32 1e-05, %v400_v61 }
 0x493   :  { %1889 = vrsqrt.f32 %v401_v62  ;;  %vm408_vm10 = vweird.f32 %v401_v62 }
 0x499   :  { %v1890_v63 = vpop.eup %1889 }
 0x49a   :  { %v403_v0 = vmul.f32 %v1890_v63, %v401_v62  ;;  %vm409_vm9 = vweird.f32 %v1890_v63 }
 0x49b   :  { %vm410_vm11 = vmor %vm408_vm10, %vm409_vm9 }
 0x49c   :  { %v404_v1 = vmul.f32 %v1890_v63, %v403_v0 }
 0x49e   :  { %v405_v2 = vmul.f32 0.5, %v404_v1 }
 0x4a0   :  { %v406_v3 = vsub.f32 1.5, %v405_v2 }
 0x4a2   :  { %v407_v4 = vmul.f32 %v1890_v63, %v406_v3 }
 0x4a4   :  { %v411_v6 = vsel %vm410_vm11, %v1890_v63, %v407_v4 }
 0x4a5   :  { %v412_v7 = vmul.f32 %v411_v6, %v387_v41  ;;  %v413_v8 = vmul.f32 %v411_v6, %v388_v42 }
 0x4a7   :  { %v415_v10 = vmul.f32 %v414_v5, %v412_v7  ;;  %v416_v11 = vmul.f32 %v414_v5, %v413_v8 }
 0x4a9   :  { %v418_v12 = vadd.f32 %v417_v9, %v415_v10  ;;  %v419_v13 = vadd.f32 %v417_v9, %v416_v11 }
 0x4ab   :  { %v420_v14 = vmax.f32 %v418_v12, 0.0  ;;  %v421_v15 = vmax.f32 %v419_v13, 0.0 }
 0x4ad   :  { %v432_v16 = vpack.c.bf16 %v421_v15, %v420_v14 }
 0x4af   :  { %1731 = vmatmul.msk.bf16.vlgmr.msrb.gmra.mxu1 %vm376_vm8, %v432_v16 }
 0x52c   :  { %v469_v19 = vpop.f32.mrf.mxu1 }
 0x52d   :  { %578 = vrot.lane.b32.xlu0 %v469_v19, %s2046_s12  ;;  %v475_v44 = vmul.f32 %v474_v18, %v469_v19 }
 0x52f   :  { %564 = vrot.lane.b32.xlu1 %v475_v44, %s2046_s12  ;;  %v477_v23 = vsel %vm177_vm6, %v475_v44, 0.0 }
 0x534   :  { %v471_v20 = vpop.f32.mrf.mxu1 }
 0x535   :  { %580 = vrot.lane.b32.xlu2 %v471_v20, %s2046_s12  ;;  %1732 = vmatpush.xpose.msk.msra.mxu3 %vm177_vm6, %v471_v20  ;;  %v544_v21 = vpack.c.bf16 %v471_v20, %v469_v19  ;;  %v476_v22 = vmul.f32 %v474_v18, %v471_v20 }
 0x537   :  { %555 = vmatpush.bf16.msrb.mxu2 %v544_v21  ;;  %566 = vrot.lane.b32.xlu0 %v476_v22, %s2046_s12  ;;  %v480_v32 = vsel %vm177_vm6, %v476_v22, 0.0 }
 0x539   :  { %1733 = vmatpush.xpose.msk.msra.mxu3 %vm177_vm6, %v469_v19 }
 0x53c   :  { %1734 = vmatmul.msk.f32.vlgmr.msra.gmra.mxu3 %vm177_vm6, %v2204_v17 }
 0x53d   :  { %576 = vrot.lane.b32.xlu2 %v2204_v17, %s2046_s12 }
 0x561   :  { %478 = vadd.xlane.f32.xlu0 %v477_v23 }
 0x58f   :  { %v581_v24 = vpop.permute.xlu2 %580 }
 0x590   :  { %1736 = vmatpush.xpose.msk.msrb.mxu3 %vm177_vm6, %v581_v24 }
 0x597   :  { %v577_v27 = vpop.permute.xlu2 %576 }
 0x59f   :  { %v579_v26 = vpop.permute.xlu0 %578 }
 0x5a0   :  { %1737 = vmatpush.xpose.msk.msrb.mxu3 %vm177_vm6, %v579_v26 }
 0x5a1   :  { %v565_v28 = vpop.permute.xlu1 %564 }
 0x5a2   :  { %v570_v29 = vsel %vm177_vm6, %v565_v28, 0.0 }
 0x5a3   :  { %571 = vadd.xlane.f32.xlu2 %v570_v29  ;;  %1738 = vmatmul.msk.f32.vlgmr.msrb.gmra.mxu3 %vm177_vm6, %v577_v27 }
 0x5a9   :  { %v567_v30 = vpop.permute.xlu0 %566 }
 0x5aa   :  { %v573_v31 = vsel %vm177_vm6, %v567_v30, 0.0 }
 0x5ab   :  { %574 = vadd.xlane.f32.xlu1 %v573_v31  ;;  %481 = vadd.xlane.f32.xlu2 %v480_v32 }
 0x5bf   :  { %v509_v33 = vpop.f32.mrf.mxu3 }
 0x5c0   :  { %v512_v34 = vperm.slane %v509_v33, 0 }
 0x5d4   :  { %v479_v35 = vpop.xlane.xlu0 %478 }
 0x5d5   :  { %v513_v36 = vadd.f32 %v512_v34, %v479_v35 }
 0x5d7   :  { %v515_v37 = vmul.f32 0.2, %v513_v36 }
 0x5d9   :  { %v517_v38 = vmax.f32 %v513_v36, %v515_v37 }
 0x5db   :  { %v519_v39 = vsel %vm220_vm7, %v517_v38, -inf }
 0x5dc   :  { %520 = vmax.xlane.f32.xlu2 %v519_v39 }
 0x616   :  { %v572_v40 = vpop.xlane.xlu2 %571 }
 0x61e   :  { %v575_v43 = vpop.xlane.xlu1 %574  ;;  %v482_v45 = vpop.xlane.xlu2 %481 }
 0x61f   :  { %v514_v48 = vadd.f32 %v512_v34, %v482_v45 }
 0x621   :  { %v516_v54 = vmul.f32 0.2, %v514_v48 }
 0x623   :  { %v518_v58 = vmax.f32 %v514_v48, %v516_v54 }
 0x625   :  { %v522_v59 = vsel %vm220_vm7, %v518_v58, -inf }
 0x626   :  { %v605_v41 = vpop.f32.mrf.mxu3 }
 0x627   :  { %v608_v42 = vperm.slane %v605_v41, 0  ;;  %v671_v41 = vperm.slane %v2204_v17, 2 }
 0x629   :  { %v609_v46 = vadd.f32 %v608_v42, %v572_v40  ;;  %v610_v47 = vadd.f32 %v608_v42, %v575_v43 }
 0x62b   :  { %v611_v49 = vmul.f32 0.2, %v609_v46  ;;  %v612_v50 = vmul.f32 0.2, %v610_v47 }
 0x62d   :  { %v613_v51 = vmax.f32 %v609_v46, %v611_v49  ;;  %v614_v53 = vmax.f32 %v610_v47, %v612_v50 }
 0x62f   :  { %v615_v55 = vsel %vm220_vm7, %v613_v51, -inf  ;;  %v618_v57 = vsel %vm220_vm7, %v614_v53, -inf }
 0x630   :  { %616 = vmax.xlane.f32.xlu1 %v615_v55  ;;  %619 = vmax.xlane.f32.xlu0 %v618_v57 }
 0x638   :  { %523 = vmax.xlane.f32.xlu1 %v522_v59 }
 0x64f   :  { %v521_v60 = vpop.xlane.xlu2 %520 }
 0x650   :  { %v525_v63 = vsub.f32 %v517_v38, %v521_v60 }
 0x651   :  { %641 = vrot.lane.b32.xlu1 %v544_v21, %s2046_s12 }
 0x652   :  { %v527_v4 = vmul.f32 1.442695, %v525_v63 }
 0x6a3   :  { %v617_v61 = vpop.xlane.xlu1 %616  ;;  %v620_v62 = vpop.xlane.xlu0 %619 }
 0x6a4   :  { %v621_v0 = vsub.f32 %v613_v51, %v617_v61  ;;  %v622_v1 = vsub.f32 %v614_v53, %v620_v62 }
 0x6a6   :  { %v623_v2 = vmul.f32 1.442695, %v621_v0  ;;  %v625_v3 = vmul.f32 1.442695, %v622_v1  ;;  %v1843_v0 = vld [vmem:[#allocation5 + $0x38] sm:$0xff] }
 0x6a7   :  { %762 = vmatpush.bf16.msra.mxu1 %v1843_v0 }
 0x6a8   :  { %1891 = vpow2.f32 %v623_v2 }
 0x6a9   :  { %1893 = vpow2.f32 %v625_v3 }
 0x6aa   :  { %1895 = vpow2.f32 %v527_v4  ;;  %v1842_v4 = vld [vmem:[#allocation5 + $0x30] sm:$0xff] }
 0x6ab   :  { %v524_v5 = vpop.xlane.xlu1 %523  ;;  %763 = vmatpush.bf16.msra.mxu1 %v1842_v4 }
 0x6ac   :  { %v526_v6 = vsub.f32 %v518_v58, %v524_v5 }
 0x6ae   :  { %v1892_v7 = vpop.eup %1891  ;;  %v529_v8 = vmul.f32 1.442695, %v526_v6 }
 0x6af   :  { %v1894_v9 = vpop.eup %1893  ;;  %v627_v10 = vmul.f32 %v1892_v7, %v2175_v56  ;;  %v1841_v7 = vld [vmem:[#allocation5 + $0x28] sm:$0xff] }
 0x6b0   :  { %1897 = vpow2.f32 %v529_v8  ;;  %v628_v11 = vmul.f32 %v1894_v9, %v2173_v52  ;;  %v1896_v13 = vpop.eup %1895  ;;  %764 = vmatpush.bf16.msra.mxu1 %v1841_v7 }
 0x6b1   :  { %v629_v12 = vsel %vm220_vm7, %v627_v10, 0.0  ;;  %v531_v15 = vmul.f32 %v1896_v13, %v2175_v56 }
 0x6b2   :  { %630 = vadd.xlane.f32.xlu0 %v629_v12  ;;  %v632_v14 = vsel %vm220_vm7, %v628_v11, 0.0 }
 0x6b3   :  { %633 = vadd.xlane.f32.xlu2 %v632_v14  ;;  %v533_v44 = vsel %vm220_vm7, %v531_v15, 0.0 }
 0x6b6   :  { %v1898_v16 = vpop.eup %1897 }
 0x6b7   :  { %v532_v18 = vmul.f32 %v1898_v16, %v2173_v52 }
 0x6b9   :  { %v536_v19 = vsel %vm220_vm7, %v532_v18, 0.0 }
 0x6ba   :  { %534 = vadd.xlane.f32.xlu0 %v533_v44 }
 0x6bb   :  { %537 = vadd.xlane.f32.xlu2 %v536_v19 }
 0x6c3   :  { %v642_v20 = vpop.permute.xlu1 %641 }
 0x6c4   :  { %654 = vmatpush.bf16.msra.mxu0 %v642_v20 }
 0x725   :  { %v631_v21 = vpop.xlane.xlu0 %630 }
 0x726   :  { %1899 = vrcp.f32 %v631_v21  ;;  %v634_v22 = vpop.xlane.xlu2 %633  ;;  %v711_v21 = vperm.slane %v2204_v17, 3 }
 0x727   :  { %1901 = vrcp.f32 %v634_v22 }
 0x72c   :  { %v1900_v23 = vpop.eup %1899 }
 0x72d   :  { %v1902_v24 = vpop.eup %1901  ;;  %v637_v26 = vmul.f32 %v1900_v23, %v627_v10  ;;  %v535_v27 = vpop.xlane.xlu0 %534  ;;  %v1840_v10 = vld [vmem:[#allocation5 + $0x20] sm:$0xff]  ;;  %v714_v23 = vperm.slane %v2204_v17, 4 }
 0x72e   :  { %v638_v28 = vmul.f32 %v1902_v24, %v628_v11  ;;  %1903 = vrcp.f32 %v535_v27  ;;  %v538_v29 = vpop.xlane.xlu2 %537  ;;  %765 = vmatpush.bf16.msra.mxu1 %v1840_v10 }
 0x72f   :  { %1905 = vrcp.f32 %v538_v29 }
 0x730   :  { %v639_v30 = vpack.c.bf16 %v638_v28, %v637_v26 }
 0x732   :  { %1739 = vmatmul.msk.bf16.vlgmr.msra.gmra.mxu0 %vm220_vm7, %v639_v30 }
 0x734   :  { %v1904_v31 = vpop.eup %1903 }
 0x735   :  { %v1906_v32 = vpop.eup %1905  ;;  %v541_v33 = vmul.f32 %v1904_v31, %v531_v15 }
 0x736   :  { %v542_v34 = vmul.f32 %v1906_v32, %v532_v18 }
 0x738   :  { %v543_v35 = vpack.c.bf16 %v542_v34, %v541_v33  ;;  %v2256_v34 = vld [vmem:[%s2435_s7 + $0x10] sm:$0x1f] }
 0x73a   :  { %1735 = vmatmul.msk.bf16.vlgmr.msrb.gmra.mxu2 %vm220_vm7, %v543_v35  ;;  %v772_v35 = vperm.slane %v2256_v34, 1 }
 0x7af   :  { %v656_v36 = vpop.f32.mrf.mxu0 }
 0x7b0   :  { %663 = vrot.lane.b32.xlu0 %v656_v36, %s2047_s0 }
 0x7b7   :  { %v658_v37 = vpop.f32.mrf.mxu0 }
 0x7b8   :  { %665 = vrot.lane.b32.xlu2 %v658_v37, %s2047_s0 }
 0x7bd   :  { %v557_v38 = vpop.f32.mrf.mxu2 }
 0x7c5   :  { %v559_v40 = vpop.f32.mrf.mxu2 }
 0x812   :  { %v666_v39 = vpop.permute.xlu2 %665 }
 0x813   :  { %v670_v42 = vsel %vm177_vm6, %v559_v40, %v666_v39 }
 0x814   :  { %v673_v43 = vadd.f32 %v671_v41, %v670_v42 }
 0x816   :  { %v675_v48 = vsel %vm376_vm8, %v673_v43, 0.0 }
 0x822   :  { %v664_v45 = vpop.permute.xlu0 %663 }
 0x823   :  { %v669_v46 = vsel %vm177_vm6, %v557_v38, %v664_v45 }
 0x824   :  { %v672_v47 = vadd.f32 %v671_v41, %v669_v46 }
 0x826   :  { %v674_v49 = vsel %vm376_vm8, %v672_v47, 0.0 }
 0x827   :  { %v676_v50 = vadd.f32 %v675_v48, %v674_v49 }
 0x829   :  { %v677_v51 = vrot.slane %v676_v50, 4 }
 0x82b   :  { %v678_v53 = vadd.f32 %v677_v51, %v676_v50 }
 0x82d   :  { %v679_v54 = vrot.slane %v678_v53, 2 }
 0x82f   :  { %v680_v55 = vadd.f32 %v679_v54, %v678_v53 }
 0x831   :  { %v681_v57 = vrot.slane %v680_v55, 1 }
 0x833   :  { %v682_v58 = vadd.f32 %v681_v57, %v680_v55 }
 0x835   :  { %v683_v59 = vmul.f32 %v682_v58, %v2129_v25 }
 0x837   :  { %v684_v60 = vsub.f32 %v672_v47, %v683_v59  ;;  %v685_v61 = vsub.f32 %v673_v43, %v683_v59 }
 0x839   :  { %v686_v62 = vmul.f32 %v684_v60, %v684_v60  ;;  %v687_v63 = vmul.f32 %v685_v61, %v685_v61 }
 0x83b   :  { %v688_v1 = vsel %vm376_vm8, %v686_v62, 0.0  ;;  %v689_v2 = vsel %vm376_vm8, %v687_v63, 0.0 }
 0x83c   :  { %v690_v3 = vadd.f32 %v689_v2, %v688_v1 }
 0x83e   :  { %v691_v5 = vrot.slane %v690_v3, 4 }
 0x840   :  { %v692_v6 = vadd.f32 %v691_v5, %v690_v3 }
 0x842   :  { %v693_v8 = vrot.slane %v692_v6, 2 }
 0x844   :  { %v694_v9 = vadd.f32 %v693_v8, %v692_v6 }
 0x846   :  { %v695_v11 = vrot.slane %v694_v9, 1 }
 0x848   :  { %v696_v12 = vadd.f32 %v695_v11, %v694_v9 }
 0x84a   :  { %v697_v13 = vmul.f32 %v696_v12, %v2129_v25 }
 0x84c   :  { %v698_v14 = vadd.f32 1e-05, %v697_v13 }
 0x84e   :  { %1907 = vrsqrt.f32 %v698_v14  ;;  %vm705_vm13 = vweird.f32 %v698_v14 }
 0x854   :  { %v1908_v15 = vpop.eup %1907 }
 0x855   :  { %v700_v16 = vmul.f32 %v1908_v15, %v698_v14  ;;  %vm706_vm12 = vweird.f32 %v1908_v15 }
 0x856   :  { %vm707_vm14 = vmor %vm705_vm13, %vm706_vm12 }
 0x857   :  { %v701_v18 = vmul.f32 %v1908_v15, %v700_v16 }
 0x859   :  { %v702_v19 = vmul.f32 0.5, %v701_v18 }
 0x85b   :  { %v703_v44 = vsub.f32 1.5, %v702_v19 }
 0x85d   :  { %v704_v20 = vmul.f32 %v1908_v15, %v703_v44 }
 0x85f   :  { %v708_v22 = vsel %vm707_vm14, %v1908_v15, %v704_v20 }
 0x860   :  { %v709_v24 = vmul.f32 %v708_v22, %v684_v60  ;;  %v710_v26 = vmul.f32 %v708_v22, %v685_v61 }
 0x862   :  { %v712_v27 = vmul.f32 %v711_v21, %v709_v24  ;;  %v713_v28 = vmul.f32 %v711_v21, %v710_v26 }
 0x864   :  { %v715_v29 = vadd.f32 %v714_v23, %v712_v27  ;;  %v716_v30 = vadd.f32 %v714_v23, %v713_v28 }
 0x866   :  { %v717_v31 = vmax.f32 %v715_v29, 0.0  ;;  %v718_v32 = vmax.f32 %v716_v30, 0.0 }
 0x868   :  { %v730_v33 = vpack.c.bf16 %v718_v32, %v717_v31 }
 0x86a   :  { %1757 = vmatmul.msk.bf16.vlgmr.msra.gmra.mxu1 %vm376_vm8, %v730_v33 }
 0x8e7   :  { %v767_v36 = vpop.f32.mrf.mxu1 }
 0x8e8   :  { %876 = vrot.lane.b32.xlu0 %v767_v36, %s2046_s12  ;;  %v773_v17 = vmul.f32 %v772_v35, %v767_v36 }
 0x8ea   :  { %862 = vrot.lane.b32.xlu2 %v773_v17, %s2046_s12  ;;  %v775_v40 = vsel %vm177_vm6, %v773_v17, 0.0 }
 0x8ef   :  { %v769_v37 = vpop.f32.mrf.mxu1 }
 0x8f0   :  { %v842_v38 = vpack.c.bf16 %v769_v37, %v767_v36  ;;  %878 = vrot.lane.b32.xlu1 %v769_v37, %s2046_s12  ;;  %1758 = vmatpush.xpose.msk.msra.mxu3 %vm177_vm6, %v769_v37  ;;  %v774_v39 = vmul.f32 %v772_v35, %v769_v37 }
 0x8f2   :  { %853 = vmatpush.bf16.msra.mxu2 %v842_v38  ;;  %864 = vrot.lane.b32.xlu0 %v774_v39, %s2046_s12  ;;  %v778_v43 = vsel %vm177_vm6, %v774_v39, 0.0 }
 0x8f4   :  { %1759 = vmatpush.xpose.msk.msra.mxu3 %vm177_vm6, %v767_v36 }
 0x8f7   :  { %1760 = vmatmul.msk.f32.vlgmr.msra.gmra.mxu3 %vm177_vm6, %v2256_v34 }
 0x8f8   :  { %874 = vrot.lane.b32.xlu1 %v2256_v34, %s2046_s12 }
 0x91c   :  { %776 = vadd.xlane.f32.xlu0 %v775_v40 }
 0x944   :  { %v863_v41 = vpop.permute.xlu2 %862 }
 0x945   :  { %v868_v42 = vsel %vm177_vm6, %v863_v41, 0.0 }
 0x946   :  { %869 = vadd.xlane.f32.xlu1 %v868_v42 }
 0x94e   :  { %779 = vadd.xlane.f32.xlu1 %v778_v43 }
 0x95a   :  { %v877_v45 = vpop.permute.xlu0 %876 }
 0x962   :  { %v879_v46 = vpop.permute.xlu1 %878 }
 0x963   :  { %1762 = vmatpush.xpose.msk.msrb.mxu3 %vm177_vm6, %v879_v46 }
 0x964   :  { %v865_v47 = vpop.permute.xlu0 %864 }
 0x965   :  { %v871_v48 = vsel %vm177_vm6, %v865_v47, 0.0 }
 0x966   :  { %872 = vadd.xlane.f32.xlu2 %v871_v48 }
 0x967   :  { %1763 = vmatpush.xpose.msk.msrb.mxu3 %vm177_vm6, %v877_v45 }
 0x96a   :  { %v875_v49 = vpop.permute.xlu1 %874 }
 0x96b   :  { %1764 = vmatmul.msk.f32.vlgmr.msrb.gmra.mxu3 %vm177_vm6, %v875_v49 }
 0x97a   :  { %v807_v50 = vpop.f32.mrf.mxu3 }
 0x97b   :  { %v810_v51 = vperm.slane %v807_v50, 0 }
 0x98f   :  { %v777_v53 = vpop.xlane.xlu0 %776 }
 0x990   :  { %v811_v54 = vadd.f32 %v810_v51, %v777_v53 }
 0x992   :  { %v813_v55 = vmul.f32 0.2, %v811_v54 }
 0x994   :  { %v815_v57 = vmax.f32 %v811_v54, %v813_v55 }
 0x996   :  { %v817_v58 = vsel %vm220_vm7, %v815_v57, -inf }
 0x997   :  { %818 = vmax.xlane.f32.xlu1 %v817_v58 }
 0x9b9   :  { %v870_v59 = vpop.xlane.xlu1 %869 }
 0x9c1   :  { %v780_v62 = vpop.xlane.xlu1 %779 }
 0x9c2   :  { %v812_v2 = vadd.f32 %v810_v51, %v780_v62 }
 0x9c4   :  { %v814_v7 = vmul.f32 0.2, %v812_v2 }
 0x9c6   :  { %v816_v10 = vmax.f32 %v812_v2, %v814_v7 }
 0x9c8   :  { %v820_v11 = vsel %vm220_vm7, %v816_v10, -inf }
 0x9d9   :  { %v873_v63 = vpop.xlane.xlu2 %872 }
 0x9ee   :  { %v903_v60 = vpop.f32.mrf.mxu3 }
 0x9ef   :  { %v906_v61 = vperm.slane %v903_v60, 0 }
 0x9f1   :  { %v907_v0 = vadd.f32 %v906_v61, %v870_v59  ;;  %v908_v1 = vadd.f32 %v906_v61, %v873_v63  ;;  %v969_v59 = vperm.slane %v2256_v34, 2 }
 0x9f3   :  { %v909_v3 = vmul.f32 0.2, %v907_v0  ;;  %v910_v4 = vmul.f32 0.2, %v908_v1 }
 0x9f5   :  { %v911_v5 = vmax.f32 %v907_v0, %v909_v3  ;;  %v912_v6 = vmax.f32 %v908_v1, %v910_v4 }
 0x9f7   :  { %v913_v8 = vsel %vm220_vm7, %v911_v5, -inf  ;;  %v916_v9 = vsel %vm220_vm7, %v912_v6, -inf }
 0x9f8   :  { %914 = vmax.xlane.f32.xlu2 %v913_v8  ;;  %917 = vmax.xlane.f32.xlu0 %v916_v9 }
 0xa00   :  { %821 = vmax.xlane.f32.xlu2 %v820_v11 }
 0xa0a   :  { %v819_v12 = vpop.xlane.xlu1 %818 }
 0xa0b   :  { %v823_v15 = vsub.f32 %v815_v57, %v819_v12 }
 0xa0d   :  { %v825_v20 = vmul.f32 1.442695, %v823_v15 }
 0xa18   :  { %939 = vrot.lane.b32.xlu2 %v842_v38, %s2046_s12 }
 0xa6b   :  { %v915_v13 = vpop.xlane.xlu2 %914  ;;  %v918_v14 = vpop.xlane.xlu0 %917 }
 0xa6c   :  { %v919_v16 = vsub.f32 %v911_v5, %v915_v13  ;;  %v920_v18 = vsub.f32 %v912_v6, %v918_v14 }
 0xa6e   :  { %v921_v19 = vmul.f32 1.442695, %v919_v16  ;;  %v923_v44 = vmul.f32 1.442695, %v920_v18  ;;  %v1847_v16 = vld [vmem:[#allocation5 + $0x58] sm:$0xff] }
 0xa6f   :  { %1060 = vmatpush.bf16.msrb.mxu1 %v1847_v16 }
 0xa70   :  { %1909 = vpow2.f32 %v921_v19 }
 0xa71   :  { %1911 = vpow2.f32 %v923_v44 }
 0xa72   :  { %1913 = vpow2.f32 %v825_v20  ;;  %v1846_v20 = vld [vmem:[#allocation5 + $0x50] sm:$0xff] }
 0xa73   :  { %v822_v21 = vpop.xlane.xlu2 %821  ;;  %1061 = vmatpush.bf16.msrb.mxu1 %v1846_v20 }
 0xa74   :  { %v824_v22 = vsub.f32 %v816_v10, %v822_v21 }
 0xa76   :  { %v1910_v23 = vpop.eup %1909  ;;  %v827_v24 = vmul.f32 1.442695, %v824_v22 }
 0xa77   :  { %v1912_v26 = vpop.eup %1911  ;;  %v925_v27 = vmul.f32 %v1910_v23, %v2175_v56  ;;  %v1845_v23 = vld [vmem:[#allocation5 + $0x48] sm:$0xff] }
 0xa78   :  { %1915 = vpow2.f32 %v827_v24  ;;  %v926_v28 = vmul.f32 %v1912_v26, %v2173_v52  ;;  %v1914_v30 = vpop.eup %1913  ;;  %1062 = vmatpush.bf16.msrb.mxu1 %v1845_v23 }
 0xa79   :  { %v927_v29 = vsel %vm220_vm7, %v925_v27, 0.0  ;;  %v829_v33 = vmul.f32 %v1914_v30, %v2175_v56 }
 0xa7a   :  { %928 = vadd.xlane.f32.xlu0 %v927_v29  ;;  %v930_v31 = vsel %vm220_vm7, %v926_v28, 0.0 }
 0xa7b   :  { %931 = vadd.xlane.f32.xlu1 %v930_v31  ;;  %v940_v32 = vpop.permute.xlu2 %939  ;;  %v831_v37 = vsel %vm220_vm7, %v829_v33, 0.0 }
 0xa7c   :  { %952 = vmatpush.bf16.msrb.mxu0 %v940_v32 }
 0xa7e   :  { %v1916_v35 = vpop.eup %1915 }
 0xa7f   :  { %v830_v36 = vmul.f32 %v1916_v35, %v2173_v52 }
 0xa81   :  { %v834_v17 = vsel %vm220_vm7, %v830_v36, 0.0 }
 0xa82   :  { %832 = vadd.xlane.f32.xlu0 %v831_v37 }
 0xa83   :  { %835 = vadd.xlane.f32.xlu1 %v834_v17 }
 0xaed   :  { %v929_v38 = vpop.xlane.xlu0 %928 }
 0xaee   :  { %1917 = vrcp.f32 %v929_v38  ;;  %v932_v39 = vpop.xlane.xlu1 %931  ;;  %v1009_v38 = vperm.slane %v2256_v34, 3 }
 0xaef   :  { %1919 = vrcp.f32 %v932_v39 }
 0xaf4   :  { %v1918_v40 = vpop.eup %1917 }
 0xaf5   :  { %v1920_v41 = vpop.eup %1919  ;;  %v935_v42 = vmul.f32 %v1918_v40, %v925_v27  ;;  %v833_v43 = vpop.xlane.xlu0 %832  ;;  %v1844_v27 = vld [vmem:[#allocation5 + $0x40] sm:$0xff]  ;;  %v1012_v40 = vperm.slane %v2256_v34, 4 }
 0xaf6   :  { %v936_v45 = vmul.f32 %v1920_v41, %v926_v28  ;;  %1921 = vrcp.f32 %v833_v43  ;;  %v836_v46 = vpop.xlane.xlu1 %835  ;;  %1063 = vmatpush.bf16.msrb.mxu1 %v1844_v27 }
 0xaf7   :  { %1923 = vrcp.f32 %v836_v46 }
 0xaf8   :  { %v937_v47 = vpack.c.bf16 %v936_v45, %v935_v42 }
 0xafa   :  { %1765 = vmatmul.msk.bf16.vlgmr.msrb.gmra.mxu0 %vm220_vm7, %v937_v47 }
 0xafc   :  { %v1922_v48 = vpop.eup %1921 }
 0xafd   :  { %v1924_v49 = vpop.eup %1923  ;;  %v839_v50 = vmul.f32 %v1922_v48, %v829_v33 }
 0xafe   :  { %v840_v51 = vmul.f32 %v1924_v49, %v830_v36 }
 0xb00   :  { %v841_v53 = vpack.c.bf16 %v840_v51, %v839_v50  ;;  %v2308_v51 = vld [vmem:[%s2435_s7 + $0x18] sm:$0x1f] }
 0xb02   :  { %1761 = vmatmul.msk.bf16.vlgmr.msra.gmra.mxu2 %vm220_vm7, %v841_v53  ;;  %v1070_v53 = vperm.slane %v2308_v51, 1 }
 0xb77   :  { %v954_v54 = vpop.f32.mrf.mxu0 }
 0xb78   :  { %961 = vrot.lane.b32.xlu0 %v954_v54, %s2047_s0 }
 0xb7f   :  { %v956_v55 = vpop.f32.mrf.mxu0 }
 0xb80   :  { %963 = vrot.lane.b32.xlu1 %v956_v55, %s2047_s0 }
 0xb85   :  { %v855_v57 = vpop.f32.mrf.mxu2 }
 0xb8d   :  { %v857_v61 = vpop.f32.mrf.mxu2 }
 0xbea   :  { %v962_v58 = vpop.permute.xlu0 %961 }
 0xbeb   :  { %v967_v60 = vsel %vm177_vm6, %v855_v57, %v962_v58 }
 0xbec   :  { %v970_v62 = vadd.f32 %v969_v59, %v967_v60 }
 0xbee   :  { %v972_v2 = vsel %vm376_vm8, %v970_v62, 0.0 }
 0xbf2   :  { %v964_v63 = vpop.permute.xlu1 %963 }
 0xbf3   :  { %v968_v0 = vsel %vm177_vm6, %v857_v61, %v964_v63 }
 0xbf4   :  { %v971_v1 = vadd.f32 %v969_v59, %v968_v0 }
 0xbf6   :  { %v973_v3 = vsel %vm376_vm8, %v971_v1, 0.0 }
 0xbf7   :  { %v974_v4 = vadd.f32 %v973_v3, %v972_v2 }
 0xbf9   :  { %v975_v5 = vrot.slane %v974_v4, 4 }
 0xbfb   :  { %v976_v6 = vadd.f32 %v975_v5, %v974_v4 }
 0xbfd   :  { %v977_v7 = vrot.slane %v976_v6, 2 }
 0xbff   :  { %v978_v8 = vadd.f32 %v977_v7, %v976_v6 }
 0xc01   :  { %v979_v9 = vrot.slane %v978_v8, 1 }
 0xc03   :  { %v980_v10 = vadd.f32 %v979_v9, %v978_v8 }
 0xc05   :  { %v981_v11 = vmul.f32 %v980_v10, %v2129_v25 }
 0xc07   :  { %v982_v12 = vsub.f32 %v970_v62, %v981_v11  ;;  %v983_v13 = vsub.f32 %v971_v1, %v981_v11 }
 0xc09   :  { %v984_v14 = vmul.f32 %v982_v12, %v982_v12  ;;  %v985_v15 = vmul.f32 %v983_v13, %v983_v13 }
 0xc0b   :  { %v986_v18 = vsel %vm376_vm8, %v984_v14, 0.0  ;;  %v987_v19 = vsel %vm376_vm8, %v985_v15, 0.0 }
 0xc0c   :  { %v988_v44 = vadd.f32 %v987_v19, %v986_v18 }
 0xc0e   :  { %v989_v21 = vrot.slane %v988_v44, 4 }
 0xc10   :  { %v990_v22 = vadd.f32 %v989_v21, %v988_v44 }
 0xc12   :  { %v991_v24 = vrot.slane %v990_v22, 2 }
 0xc14   :  { %v992_v26 = vadd.f32 %v991_v24, %v990_v22 }
 0xc16   :  { %v993_v28 = vrot.slane %v992_v26, 1 }
 0xc18   :  { %v994_v29 = vadd.f32 %v993_v28, %v992_v26 }
 0xc1a   :  { %v995_v30 = vmul.f32 %v994_v29, %v2129_v25 }
 0xc1c   :  { %v996_v31 = vadd.f32 1e-05, %v995_v30 }
 0xc1e   :  { %1925 = vrsqrt.f32 %v996_v31  ;;  %vm1003_vm0 = vweird.f32 %v996_v31 }
 0xc24   :  { %v1926_v32 = vpop.eup %1925 }
 0xc25   :  { %v998_v33 = vmul.f32 %v1926_v32, %v996_v31  ;;  %vm1004_vm15 = vweird.f32 %v1926_v32 }
 0xc26   :  { %vm1005_vm1 = vmor %vm1003_vm0, %vm1004_vm15 }
 0xc27   :  { %v999_v35 = vmul.f32 %v1926_v32, %v998_v33 }
 0xc29   :  { %v1000_v36 = vmul.f32 0.5, %v999_v35 }
 0xc2b   :  { %v1001_v17 = vsub.f32 1.5, %v1000_v36 }
 0xc2d   :  { %v1002_v37 = vmul.f32 %v1926_v32, %v1001_v17 }
 0xc2f   :  { %v1006_v39 = vsel %vm1005_vm1, %v1926_v32, %v1002_v37 }
 0xc30   :  { %v1007_v41 = vmul.f32 %v1006_v39, %v982_v12  ;;  %v1008_v42 = vmul.f32 %v1006_v39, %v983_v13 }
 0xc32   :  { %v1010_v43 = vmul.f32 %v1009_v38, %v1007_v41  ;;  %v1011_v45 = vmul.f32 %v1009_v38, %v1008_v42 }
 0xc34   :  { %v1013_v46 = vadd.f32 %v1012_v40, %v1010_v43  ;;  %v1014_v47 = vadd.f32 %v1012_v40, %v1011_v45 }
 0xc36   :  { %v1015_v48 = vmax.f32 %v1013_v46, 0.0  ;;  %v1016_v49 = vmax.f32 %v1014_v47, 0.0 }
 0xc38   :  { %v1028_v50 = vpack.c.bf16 %v1016_v49, %v1015_v48 }
 0xc3a   :  { %1783 = vmatmul.msk.bf16.vlgmr.msrb.gmra.mxu1 %vm376_vm8, %v1028_v50 }
 0xcb7   :  { %v1065_v54 = vpop.f32.mrf.mxu1 }
 0xcb8   :  { %1174 = vrot.lane.b32.xlu0 %v1065_v54, %s2046_s12  ;;  %v1071_v34 = vmul.f32 %v1070_v53, %v1065_v54 }
 0xcba   :  { %1160 = vrot.lane.b32.xlu1 %v1071_v34, %s2046_s12  ;;  %v1073_v59 = vsel %vm177_vm6, %v1071_v34, 0.0 }
 0xcbf   :  { %v1067_v55 = vpop.f32.mrf.mxu1 }
 0xcc0   :  { %v1140_v57 = vpack.c.bf16 %v1067_v55, %v1065_v54  ;;  %1176 = vrot.lane.b32.xlu2 %v1067_v55, %s2046_s12  ;;  %1784 = vmatpush.xpose.msk.msra.mxu3 %vm177_vm6, %v1067_v55  ;;  %v1072_v58 = vmul.f32 %v1070_v53, %v1067_v55 }
 0xcc2   :  { %1151 = vmatpush.bf16.msrb.mxu2 %v1140_v57  ;;  %1162 = vrot.lane.b32.xlu0 %v1072_v58, %s2046_s12  ;;  %v1076_v3 = vsel %vm177_vm6, %v1072_v58, 0.0 }
 0xcc4   :  { %1785 = vmatpush.xpose.msk.msra.mxu3 %vm177_vm6, %v1065_v54 }
 0xcc7   :  { %1786 = vmatmul.msk.f32.vlgmr.msra.gmra.mxu3 %vm177_vm6, %v2308_v51 }
 0xcc8   :  { %1172 = vrot.lane.b32.xlu2 %v2308_v51, %s2046_s12 }
 0xcec   :  { %1074 = vadd.xlane.f32.xlu0 %v1073_v59 }
 0xd1a   :  { %v1177_v60 = vpop.permute.xlu2 %1176 }
 0xd1b   :  { %1788 = vmatpush.xpose.msk.msrb.mxu3 %vm177_vm6, %v1177_v60 }
 0xd22   :  { %v1173_v62 = vpop.permute.xlu2 %1172 }
 0xd2a   :  { %v1175_v61 = vpop.permute.xlu0 %1174 }
 0xd2b   :  { %1789 = vmatpush.xpose.msk.msrb.mxu3 %vm177_vm6, %v1175_v61 }
 0xd2c   :  { %v1161_v63 = vpop.permute.xlu1 %1160 }
 0xd2d   :  { %v1166_v0 = vsel %vm177_vm6, %v1161_v63, 0.0 }
 0xd2e   :  { %1167 = vadd.xlane.f32.xlu2 %v1166_v0  ;;  %1790 = vmatmul.msk.f32.vlgmr.msrb.gmra.mxu3 %vm177_vm6, %v1173_v62 }
 0xd34   :  { %v1163_v1 = vpop.permute.xlu0 %1162 }
 0xd35   :  { %v1169_v2 = vsel %vm177_vm6, %v1163_v1, 0.0 }
 0xd36   :  { %1170 = vadd.xlane.f32.xlu1 %v1169_v2  ;;  %1077 = vadd.xlane.f32.xlu2 %v1076_v3 }
 0xd4a   :  { %v1105_v4 = vpop.f32.mrf.mxu3 }
 0xd4b   :  { %v1108_v5 = vperm.slane %v1105_v4, 0 }
 0xd5f   :  { %v1075_v6 = vpop.xlane.xlu0 %1074 }
 0xd60   :  { %v1109_v7 = vadd.f32 %v1108_v5, %v1075_v6 }
 0xd62   :  { %v1111_v8 = vmul.f32 0.2, %v1109_v7 }
 0xd64   :  { %v1113_v9 = vmax.f32 %v1109_v7, %v1111_v8 }
 0xd66   :  { %v1115_v10 = vsel %vm220_vm7, %v1113_v9, -inf }
 0xd67   :  { %1116 = vmax.xlane.f32.xlu2 %v1115_v10 }
 0xda1   :  { %v1168_v11 = vpop.xlane.xlu2 %1167 }
 0xda9   :  { %v1171_v14 = vpop.xlane.xlu1 %1170  ;;  %v1078_v15 = vpop.xlane.xlu2 %1077 }
 0xdaa   :  { %v1110_v19 = vadd.f32 %v1108_v5, %v1078_v15 }
 0xdac   :  { %v1112_v23 = vmul.f32 0.2, %v1110_v19 }
 0xdae   :  { %v1114_v27 = vmax.f32 %v1110_v19, %v1112_v23 }
 0xdb0   :  { %v1118_v28 = vsel %vm220_vm7, %v1114_v27, -inf }
 0xdb1   :  { %v1201_v12 = vpop.f32.mrf.mxu3 }
 0xdb2   :  { %v1204_v13 = vperm.slane %v1201_v12, 0  ;;  %v1267_v12 = vperm.slane %v2308_v51, 2 }
 0xdb4   :  { %v1205_v16 = vadd.f32 %v1204_v13, %v1168_v11  ;;  %v1206_v18 = vadd.f32 %v1204_v13, %v1171_v14 }
 0xdb6   :  { %v1207_v44 = vmul.f32 0.2, %v1205_v16  ;;  %v1208_v20 = vmul.f32 0.2, %v1206_v18 }
 0xdb8   :  { %v1209_v21 = vmax.f32 %v1205_v16, %v1207_v44  ;;  %v1210_v22 = vmax.f32 %v1206_v18, %v1208_v20 }
 0xdba   :  { %v1211_v24 = vsel %vm220_vm7, %v1209_v21, -inf  ;;  %v1214_v26 = vsel %vm220_vm7, %v1210_v22, -inf }
 0xdbb   :  { %1212 = vmax.xlane.f32.xlu1 %v1211_v24  ;;  %1215 = vmax.xlane.f32.xlu0 %v1214_v26 }
 0xdc3   :  { %1119 = vmax.xlane.f32.xlu1 %v1118_v28 }
 0xdda   :  { %v1117_v29 = vpop.xlane.xlu2 %1116 }
 0xddb   :  { %v1121_v32 = vsub.f32 %v1113_v9, %v1117_v29 }
 0xddc   :  { %1237 = vrot.lane.b32.xlu1 %v1140_v57, %s2046_s12 }
 0xddd   :  { %v1123_v37 = vmul.f32 1.442695, %v1121_v32 }
 0xe2e   :  { %v1213_v30 = vpop.xlane.xlu1 %1212  ;;  %v1216_v31 = vpop.xlane.xlu0 %1215 }
 0xe2f   :  { %v1217_v33 = vsub.f32 %v1209_v21, %v1213_v30  ;;  %v1218_v35 = vsub.f32 %v1210_v22, %v1216_v31 }
 0xe31   :  { %v1219_v36 = vmul.f32 1.442695, %v1217_v33  ;;  %v1221_v17 = vmul.f32 1.442695, %v1218_v35  ;;  %v1851_v33 = vld [vmem:[#allocation5 + $0x78] sm:$0xff] }
 0xe32   :  { %1358 = vmatpush.bf16.msra.mxu1 %v1851_v33 }
 0xe33   :  { %1927 = vpow2.f32 %v1219_v36 }
 0xe34   :  { %1929 = vpow2.f32 %v1221_v17 }
 0xe35   :  { %1931 = vpow2.f32 %v1123_v37  ;;  %v1850_v37 = vld [vmem:[#allocation5 + $0x70] sm:$0xff] }
 0xe36   :  { %v1120_v38 = vpop.xlane.xlu1 %1119  ;;  %1359 = vmatpush.bf16.msra.mxu1 %v1850_v37 }
 0xe37   :  { %v1122_v39 = vsub.f32 %v1114_v27, %v1120_v38 }
 0xe39   :  { %v1928_v40 = vpop.eup %1927  ;;  %v1125_v41 = vmul.f32 1.442695, %v1122_v39 }
 0xe3a   :  { %v1930_v42 = vpop.eup %1929  ;;  %v1223_v43 = vmul.f32 %v1928_v40, %v2175_v56  ;;  %v1849_v40 = vld [vmem:[#allocation5 + $0x68] sm:$0xff] }
 0xe3b   :  { %1933 = vpow2.f32 %v1125_v41  ;;  %v1224_v45 = vmul.f32 %v1930_v42, %v2173_v52  ;;  %v1932_v47 = vpop.eup %1931  ;;  %1360 = vmatpush.bf16.msra.mxu1 %v1849_v40 }
 0xe3c   :  { %v1225_v46 = vsel %vm220_vm7, %v1223_v43, 0.0  ;;  %v1127_v49 = vmul.f32 %v1932_v47, %v2175_v56 }
 0xe3d   :  { %1226 = vadd.xlane.f32.xlu0 %v1225_v46  ;;  %v1228_v48 = vsel %vm220_vm7, %v1224_v45, 0.0 }
 0xe3e   :  { %1229 = vadd.xlane.f32.xlu2 %v1228_v48  ;;  %v1129_v34 = vsel %vm220_vm7, %v1127_v49, 0.0 }
 0xe41   :  { %v1934_v50 = vpop.eup %1933 }
 0xe42   :  { %v1128_v53 = vmul.f32 %v1934_v50, %v2173_v52 }
 0xe44   :  { %v1132_v54 = vsel %vm220_vm7, %v1128_v53, 0.0 }
 0xe45   :  { %1130 = vadd.xlane.f32.xlu0 %v1129_v34 }
 0xe46   :  { %1133 = vadd.xlane.f32.xlu2 %v1132_v54 }
 0xe4e   :  { %v1238_v55 = vpop.permute.xlu1 %1237 }
 0xe4f   :  { %1250 = vmatpush.bf16.msra.mxu0 %v1238_v55 }
 0xeb0   :  { %v1227_v57 = vpop.xlane.xlu0 %1226 }
 0xeb1   :  { %1935 = vrcp.f32 %v1227_v57  ;;  %v1230_v58 = vpop.xlane.xlu2 %1229  ;;  %v1307_v57 = vperm.slane %v2308_v51, 3 }
 0xeb2   :  { %1937 = vrcp.f32 %v1230_v58 }
 0xeb7   :  { %v1936_v59 = vpop.eup %1935 }
 0xeb8   :  { %v1938_v60 = vpop.eup %1937  ;;  %v1233_v61 = vmul.f32 %v1936_v59, %v1223_v43  ;;  %v1131_v62 = vpop.xlane.xlu0 %1130  ;;  %v1848_v43 = vld [vmem:[#allocation5 + $0x60] sm:$0xff]  ;;  %v1310_v59 = vperm.slane %v2308_v51, 4 }
 0xeb9   :  { %v1234_v63 = vmul.f32 %v1938_v60, %v1224_v45  ;;  %1939 = vrcp.f32 %v1131_v62  ;;  %v1134_v0 = vpop.xlane.xlu2 %1133  ;;  %1361 = vmatpush.bf16.msra.mxu1 %v1848_v43 }
 0xeba   :  { %1941 = vrcp.f32 %v1134_v0 }
 0xebb   :  { %v1235_v1 = vpack.c.bf16 %v1234_v63, %v1233_v61 }
 0xebd   :  { %1791 = vmatmul.msk.bf16.vlgmr.msra.gmra.mxu0 %vm220_vm7, %v1235_v1 }
 0xebf   :  { %v1940_v2 = vpop.eup %1939 }
 0xec0   :  { %v1942_v3 = vpop.eup %1941  ;;  %v1137_v4 = vmul.f32 %v1940_v2, %v1127_v49 }
 0xec1   :  { %v1138_v5 = vmul.f32 %v1942_v3, %v1128_v53 }
 0xec3   :  { %v1139_v6 = vpack.c.bf16 %v1138_v5, %v1137_v4  ;;  %v2360_v5 = vld [vmem:[%s2435_s7 + $0x20] sm:$0x1f] }
 0xec5   :  { %1787 = vmatmul.msk.bf16.vlgmr.msrb.gmra.mxu2 %vm220_vm7, %v1139_v6  ;;  %v1368_v6 = vperm.slane %v2360_v5, 1 }
 0xf3a   :  { %v1252_v7 = vpop.f32.mrf.mxu0 }
 0xf3b   :  { %1259 = vrot.lane.b32.xlu0 %v1252_v7, %s2047_s0 }
 0xf42   :  { %v1254_v8 = vpop.f32.mrf.mxu0 }
 0xf43   :  { %1261 = vrot.lane.b32.xlu2 %v1254_v8, %s2047_s0 }
 0xf48   :  { %v1153_v9 = vpop.f32.mrf.mxu2 }
 0xf50   :  { %v1155_v11 = vpop.f32.mrf.mxu2 }
 0xf9d   :  { %v1262_v10 = vpop.permute.xlu2 %1261 }
 0xf9e   :  { %v1266_v13 = vsel %vm177_vm6, %v1155_v11, %v1262_v10 }
 0xf9f   :  { %v1269_v14 = vadd.f32 %v1267_v12, %v1266_v13 }
 0xfa1   :  { %v1271_v19 = vsel %vm376_vm8, %v1269_v14, 0.0 }
 0xfad   :  { %v1260_v15 = vpop.permute.xlu0 %1259 }
 0xfae   :  { %v1265_v16 = vsel %vm177_vm6, %v1153_v9, %v1260_v15 }
 0xfaf   :  { %v1268_v18 = vadd.f32 %v1267_v12, %v1265_v16 }
 0xfb1   :  { %v1270_v44 = vsel %vm376_vm8, %v1268_v18, 0.0 }
 0xfb2   :  { %v1272_v20 = vadd.f32 %v1271_v19, %v1270_v44 }
 0xfb4   :  { %v1273_v21 = vrot.slane %v1272_v20, 4 }
 0xfb6   :  { %v1274_v22 = vadd.f32 %v1273_v21, %v1272_v20 }
 0xfb8   :  { %v1275_v23 = vrot.slane %v1274_v22, 2 }
 0xfba   :  { %v1276_v24 = vadd.f32 %v1275_v23, %v1274_v22 }
 0xfbc   :  { %v1277_v26 = vrot.slane %v1276_v24, 1 }
 0xfbe   :  { %v1278_v27 = vadd.f32 %v1277_v26, %v1276_v24 }
 0xfc0   :  { %v1279_v28 = vmul.f32 %v1278_v27, %v2129_v25 }
 0xfc2   :  { %v1280_v29 = vsub.f32 %v1268_v18, %v1279_v28  ;;  %v1281_v30 = vsub.f32 %v1269_v14, %v1279_v28 }
 0xfc4   :  { %v1282_v31 = vmul.f32 %v1280_v29, %v1280_v29  ;;  %v1283_v32 = vmul.f32 %v1281_v30, %v1281_v30 }
 0xfc6   :  { %v1284_v35 = vsel %vm376_vm8, %v1282_v31, 0.0  ;;  %v1285_v36 = vsel %vm376_vm8, %v1283_v32, 0.0 }
 0xfc7   :  { %v1286_v17 = vadd.f32 %v1285_v36, %v1284_v35 }
 0xfc9   :  { %v1287_v38 = vrot.slane %v1286_v17, 4 }
 0xfcb   :  { %v1288_v39 = vadd.f32 %v1287_v38, %v1286_v17 }
 0xfcd   :  { %v1289_v41 = vrot.slane %v1288_v39, 2 }
 0xfcf   :  { %v1290_v42 = vadd.f32 %v1289_v41, %v1288_v39 }
 0xfd1   :  { %v1291_v45 = vrot.slane %v1290_v42, 1 }
 0xfd3   :  { %v1292_v46 = vadd.f32 %v1291_v45, %v1290_v42 }
 0xfd5   :  { %v1293_v47 = vmul.f32 %v1292_v46, %v2129_v25 }
 0xfd7   :  { %v1294_v48 = vadd.f32 1e-05, %v1293_v47 }
 0xfd9   :  { %1943 = vrsqrt.f32 %v1294_v48  ;;  %vm1301_vm3 = vweird.f32 %v1294_v48 }
 0xfdf   :  { %v1944_v49 = vpop.eup %1943 }
 0xfe0   :  { %v1296_v50 = vmul.f32 %v1944_v49, %v1294_v48  ;;  %vm1302_vm2 = vweird.f32 %v1944_v49 }
 0xfe1   :  { %vm1303_vm4 = vmor %vm1301_vm3, %vm1302_vm2 }
 0xfe2   :  { %v1297_v53 = vmul.f32 %v1944_v49, %v1296_v50 }
 0xfe4   :  { %v1298_v54 = vmul.f32 0.5, %v1297_v53 }
 0xfe6   :  { %v1299_v34 = vsub.f32 1.5, %v1298_v54 }
 0xfe8   :  { %v1300_v55 = vmul.f32 %v1944_v49, %v1299_v34 }
 0xfea   :  { %v1304_v58 = vsel %vm1303_vm4, %v1944_v49, %v1300_v55 }
 0xfeb   :  { %v1305_v60 = vmul.f32 %v1304_v58, %v1280_v29  ;;  %v1306_v61 = vmul.f32 %v1304_v58, %v1281_v30 }
 0xfed   :  { %v1308_v62 = vmul.f32 %v1307_v57, %v1305_v60  ;;  %v1309_v63 = vmul.f32 %v1307_v57, %v1306_v61 }
 0xfef   :  { %v1311_v0 = vadd.f32 %v1310_v59, %v1308_v62  ;;  %v1312_v1 = vadd.f32 %v1310_v59, %v1309_v63 }
 0xff1   :  { %v1313_v2 = vmax.f32 %v1311_v0, 0.0  ;;  %v1314_v3 = vmax.f32 %v1312_v1, 0.0 }
 0xff3   :  { %v1326_v4 = vpack.c.bf16 %v1314_v3, %v1313_v2 }
 0xff5   :  { %1809 = vmatmul.msk.bf16.vlgmr.msra.gmra.mxu1 %vm376_vm8, %v1326_v4 }
0x1072   :  { %v1363_v7 = vpop.f32.mrf.mxu1 }
0x1073   :  { %1472 = vrot.lane.b32.xlu0 %v1363_v7, %s2046_s12  ;;  %v1369_v51 = vmul.f32 %v1368_v6, %v1363_v7 }
0x1075   :  { %1458 = vrot.lane.b32.xlu2 %v1369_v51, %s2046_s12  ;;  %v1371_v11 = vsel %vm177_vm6, %v1369_v51, 0.0 }
0x107a   :  { %v1365_v8 = vpop.f32.mrf.mxu1 }
0x107b   :  { %v1438_v9 = vpack.c.bf16 %v1365_v8, %v1363_v7  ;;  %1474 = vrot.lane.b32.xlu1 %v1365_v8, %s2046_s12  ;;  %1810 = vmatpush.xpose.msk.msra.mxu3 %vm177_vm6, %v1365_v8  ;;  %v1370_v10 = vmul.f32 %v1368_v6, %v1365_v8 }
0x107d   :  { %1449 = vmatpush.bf16.msra.mxu2 %v1438_v9  ;;  %1460 = vrot.lane.b32.xlu0 %v1370_v10, %s2046_s12  ;;  %v1374_v44 = vsel %vm177_vm6, %v1370_v10, 0.0 }
0x107f   :  { %1811 = vmatpush.xpose.msk.msra.mxu3 %vm177_vm6, %v1363_v7 }
0x1082   :  { %1812 = vmatmul.msk.f32.vlgmr.msra.gmra.mxu3 %vm177_vm6, %v2360_v5 }
0x1083   :  { %1470 = vrot.lane.b32.xlu1 %v2360_v5, %s2046_s12 }
0x10a7   :  { %1372 = vadd.xlane.f32.xlu0 %v1371_v11 }
0x10cf   :  { %v1459_v12 = vpop.permute.xlu2 %1458 }
0x10d0   :  { %v1464_v13 = vsel %vm177_vm6, %v1459_v12, 0.0 }
0x10d1   :  { %1465 = vadd.xlane.f32.xlu1 %v1464_v13 }
0x10e5   :  { %v1473_v14 = vpop.permute.xlu0 %1472 }
0x10ed   :  { %v1475_v15 = vpop.permute.xlu1 %1474 }
0x10ee   :  { %1814 = vmatpush.xpose.msk.msrb.mxu3 %vm177_vm6, %v1475_v15 }
0x10ef   :  { %v1461_v16 = vpop.permute.xlu0 %1460 }
0x10f0   :  { %v1467_v18 = vsel %vm177_vm6, %v1461_v16, 0.0 }
0x10f1   :  { %1468 = vadd.xlane.f32.xlu2 %v1467_v18 }
0x10f2   :  { %1815 = vmatpush.xpose.msk.msrb.mxu3 %vm177_vm6, %v1473_v14 }
0x10f5   :  { %v1471_v19 = vpop.permute.xlu1 %1470 }
0x10f6   :  { %1816 = vmatmul.msk.f32.vlgmr.msrb.gmra.mxu3 %vm177_vm6, %v1471_v19 }
0x10f9   :  { %1375 = vadd.xlane.f32.xlu2 %v1374_v44 }
0x1105   :  { %v1403_v20 = vpop.f32.mrf.mxu3 }
0x1106   :  { %v1406_v21 = vperm.slane %v1403_v20, 0 }
0x111a   :  { %v1373_v22 = vpop.xlane.xlu0 %1372 }
0x111b   :  { %v1407_v23 = vadd.f32 %v1406_v21, %v1373_v22 }
0x111d   :  { %v1409_v24 = vmul.f32 0.2, %v1407_v23 }
0x111f   :  { %v1411_v26 = vmax.f32 %v1407_v23, %v1409_v24 }
0x1121   :  { %v1413_v27 = vsel %vm220_vm7, %v1411_v26, -inf }
0x1122   :  { %1414 = vmax.xlane.f32.xlu2 %v1413_v27  ;;  %v1565_v27 = vperm.slane %v2360_v5, 2 }
0x1144   :  { %v1466_v31 = vpop.xlane.xlu1 %1465 }
0x1164   :  { %v1469_v28 = vpop.xlane.xlu2 %1468 }
0x116c   :  { %v1376_v32 = vpop.xlane.xlu2 %1375 }
0x116d   :  { %v1408_v36 = vadd.f32 %v1406_v21, %v1376_v32 }
0x116f   :  { %v1410_v40 = vmul.f32 0.2, %v1408_v36 }
0x1171   :  { %v1412_v43 = vmax.f32 %v1408_v36, %v1410_v40 }
0x1173   :  { %v1416_v45 = vsel %vm220_vm7, %v1412_v43, -inf }
0x1179   :  { %v1499_v29 = vpop.f32.mrf.mxu3 }
0x117a   :  { %v1502_v30 = vperm.slane %v1499_v29, 0 }
0x117c   :  { %v1503_v33 = vadd.f32 %v1502_v30, %v1466_v31  ;;  %v1504_v35 = vadd.f32 %v1502_v30, %v1469_v28 }
0x117e   :  { %v1505_v17 = vmul.f32 0.2, %v1503_v33  ;;  %v1506_v37 = vmul.f32 0.2, %v1504_v35 }
0x1180   :  { %v1507_v38 = vmax.f32 %v1503_v33, %v1505_v17  ;;  %v1508_v39 = vmax.f32 %v1504_v35, %v1506_v37 }
0x1182   :  { %v1509_v41 = vsel %vm220_vm7, %v1507_v38, -inf  ;;  %v1512_v42 = vsel %vm220_vm7, %v1508_v39, -inf }
0x1183   :  { %1510 = vmax.xlane.f32.xlu1 %v1509_v41  ;;  %1513 = vmax.xlane.f32.xlu0 %v1512_v42 }
0x118b   :  { %1417 = vmax.xlane.f32.xlu1 %v1416_v45 }
0x1195   :  { %v1415_v46 = vpop.xlane.xlu2 %1414 }
0x1196   :  { %v1419_v49 = vsub.f32 %v1411_v26, %v1415_v46 }
0x1198   :  { %v1421_v55 = vmul.f32 1.442695, %v1419_v49 }
0x11a4   :  { %1535 = vrot.lane.b32.xlu1 %v1438_v9, %s2046_s12 }
0x11f6   :  { %v1511_v47 = vpop.xlane.xlu1 %1510  ;;  %v1514_v48 = vpop.xlane.xlu0 %1513 }
0x11f7   :  { %v1515_v50 = vsub.f32 %v1507_v38, %v1511_v47  ;;  %v1516_v53 = vsub.f32 %v1508_v39, %v1514_v48 }
0x11f9   :  { %v1517_v54 = vmul.f32 1.442695, %v1515_v50  ;;  %v1519_v34 = vmul.f32 1.442695, %v1516_v53 }
0x11fb   :  { %1945 = vpow2.f32 %v1517_v54 }
0x11fc   :  { %1947 = vpow2.f32 %v1519_v34 }
0x11fd   :  { %1949 = vpow2.f32 %v1421_v55 }
0x11fe   :  { %v1418_v57 = vpop.xlane.xlu1 %1417 }
0x11ff   :  { %v1420_v58 = vsub.f32 %v1412_v43, %v1418_v57 }
0x1201   :  { %v1946_v59 = vpop.eup %1945  ;;  %v1423_v60 = vmul.f32 1.442695, %v1420_v58 }
0x1202   :  { %v1948_v61 = vpop.eup %1947  ;;  %v1521_v62 = vmul.f32 %v1946_v59, %v2175_v56 }
0x1203   :  { %1951 = vpow2.f32 %v1423_v60  ;;  %v1522_v63 = vmul.f32 %v1948_v61, %v2173_v52  ;;  %v1950_v1 = vpop.eup %1949  ;;  %v1855_v61 = vld [vmem:[%s2436_s8 + $0x18] sm:$0xff] }
0x1204   :  { %v1523_v0 = vsel %vm220_vm7, %v1521_v62, 0.0  ;;  %v1425_v3 = vmul.f32 %v1950_v1, %v2175_v56  ;;  %1675 = vmatpush.bf16.msrb.mxu2 %v1855_v61 }
0x1205   :  { %1524 = vadd.xlane.f32.xlu0 %v1523_v0  ;;  %v1526_v2 = vsel %vm220_vm7, %v1522_v63, 0.0 }
0x1206   :  { %1527 = vadd.xlane.f32.xlu2 %v1526_v2  ;;  %v1427_v51 = vsel %vm220_vm7, %v1425_v3, 0.0 }
0x1209   :  { %v1952_v4 = vpop.eup %1951 }
0x120a   :  { %v1426_v6 = vmul.f32 %v1952_v4, %v2173_v52 }
0x120c   :  { %v1430_v7 = vsel %vm220_vm7, %v1426_v6, 0.0 }
0x120d   :  { %1428 = vadd.xlane.f32.xlu0 %v1427_v51 }
0x120e   :  { %1431 = vadd.xlane.f32.xlu2 %v1430_v7 }
0x1216   :  { %v1536_v8 = vpop.permute.xlu1 %1535 }
0x1217   :  { %1548 = vmatpush.bf16.msrb.mxu0 %v1536_v8 }
0x1278   :  { %v1525_v9 = vpop.xlane.xlu0 %1524 }
0x1279   :  { %1953 = vrcp.f32 %v1525_v9  ;;  %v1528_v10 = vpop.xlane.xlu2 %1527  ;;  %v1608_v9 = vperm.slane %v2360_v5, 4 }
0x127a   :  { %1955 = vrcp.f32 %v1528_v10 }
0x127f   :  { %v1954_v11 = vpop.eup %1953 }
0x1280   :  { %v1956_v12 = vpop.eup %1955  ;;  %v1531_v13 = vmul.f32 %v1954_v11, %v1521_v62  ;;  %v1429_v14 = vpop.xlane.xlu0 %1428  ;;  %v1854_v62 = vld [vmem:[%s2436_s8 + $0x10] sm:$0xff] }
0x1281   :  { %v1532_v56 = vmul.f32 %v1956_v12, %v1522_v63  ;;  %1957 = vrcp.f32 %v1429_v14  ;;  %v1432_v15 = vpop.xlane.xlu2 %1431  ;;  %1676 = vmatpush.bf16.msrb.mxu2 %v1854_v62  ;;  %v1853_v63 = vld [vmem:[%s2436_s8 + $0x8] sm:$0xff] }
0x1282   :  { %1959 = vrcp.f32 %v1432_v15 }
0x1283   :  { %v1533_v52 = vpack.c.bf16 %v1532_v56, %v1531_v13 }
0x1285   :  { %1817 = vmatmul.msk.bf16.vlgmr.msrb.gmra.mxu0 %vm220_vm7, %v1533_v52  ;;  %1677 = vmatpush.bf16.msrb.mxu2 %v1853_v63  ;;  %v1613_v52 = vld [vmem:[#allocation2] sm:$0x1] }
0x1287   :  { %v1958_v16 = vpop.eup %1957 }
0x1288   :  { %v1960_v18 = vpop.eup %1959  ;;  %v1435_v19 = vmul.f32 %v1958_v16, %v1425_v3  ;;  %v1852_v16 = vld [vmem:[%s2436_s8] sm:$0xff] }
0x1289   :  { %v1436_v44 = vmul.f32 %v1960_v18, %v1426_v6  ;;  %v1605_v6 = vperm.slane %v2360_v5, 3  ;;  %1678 = vmatpush.bf16.msrb.mxu2 %v1852_v16 }
0x128b   :  { %v1437_v20 = vpack.c.bf16 %v1436_v44, %v1435_v19  ;;  %v1868_v44 = vld [vmem:[%s2437_s9] ss:$0 sm:$0xff] }
0x128d   :  { %1813 = vmatmul.msk.bf16.vlgmr.msra.gmra.mxu2 %vm220_vm7, %v1437_v20 }
0x1302   :  { %v1550_v21 = vpop.f32.mrf.mxu0 }
0x1303   :  { %1557 = vrot.lane.b32.xlu0 %v1550_v21, %s2047_s0 }
0x130a   :  { %v1552_v22 = vpop.f32.mrf.mxu0 }
0x130b   :  { %1559 = vrot.lane.b32.xlu2 %v1552_v22, %s2047_s0 }
0x1310   :  { %v1451_v23 = vpop.f32.mrf.mxu2 }
0x1318   :  { %v1453_v26 = vpop.f32.mrf.mxu2 }
0x1365   :  { %v1560_v24 = vpop.permute.xlu2 %1559 }
0x1366   :  { %v1564_v28 = vsel %vm177_vm6, %v1453_v26, %v1560_v24 }
0x1367   :  { %v1567_v29 = vadd.f32 %v1565_v27, %v1564_v28 }
0x1369   :  { %v1569_v33 = vsel %vm376_vm8, %v1567_v29, 0.0 }
0x1375   :  { %v1558_v30 = vpop.permute.xlu0 %1557 }
0x1376   :  { %v1563_v31 = vsel %vm177_vm6, %v1451_v23, %v1558_v30 }
0x1377   :  { %v1566_v32 = vadd.f32 %v1565_v27, %v1563_v31 }
0x1379   :  { %v1568_v35 = vsel %vm376_vm8, %v1566_v32, 0.0 }
0x137a   :  { %v1570_v36 = vadd.f32 %v1569_v33, %v1568_v35 }
0x137c   :  { %v1571_v17 = vrot.slane %v1570_v36, 4 }
0x137e   :  { %v1572_v37 = vadd.f32 %v1571_v17, %v1570_v36 }
0x1380   :  { %v1573_v38 = vrot.slane %v1572_v37, 2 }
0x1382   :  { %v1574_v39 = vadd.f32 %v1573_v38, %v1572_v37 }
0x1384   :  { %v1575_v40 = vrot.slane %v1574_v39, 1 }
0x1386   :  { %v1576_v41 = vadd.f32 %v1575_v40, %v1574_v39 }
0x1388   :  { %v1577_v42 = vmul.f32 %v1576_v41, %v2129_v25 }
0x138a   :  { %v1578_v43 = vsub.f32 %v1566_v32, %v1577_v42  ;;  %v1579_v45 = vsub.f32 %v1567_v29, %v1577_v42 }
0x138c   :  { %v1580_v46 = vmul.f32 %v1578_v43, %v1578_v43  ;;  %v1581_v47 = vmul.f32 %v1579_v45, %v1579_v45 }
0x138e   :  { %v1582_v48 = vsel %vm376_vm8, %v1580_v46, 0.0  ;;  %v1583_v49 = vsel %vm376_vm8, %v1581_v47, 0.0 }
0x138f   :  { %v1584_v50 = vadd.f32 %v1583_v49, %v1582_v48 }
0x1391   :  { %v1585_v53 = vrot.slane %v1584_v50, 4 }
0x1393   :  { %v1586_v54 = vadd.f32 %v1585_v53, %v1584_v50 }
0x1395   :  { %v1587_v34 = vrot.slane %v1586_v54, 2 }
0x1397   :  { %v1588_v55 = vadd.f32 %v1587_v34, %v1586_v54 }
0x1399   :  { %v1589_v57 = vrot.slane %v1588_v55, 1 }
0x139b   :  { %v1590_v58 = vadd.f32 %v1589_v57, %v1588_v55 }
0x139d   :  { %v1591_v59 = vmul.f32 %v1590_v58, %v2129_v25 }
0x139f   :  { %v1592_v60 = vadd.f32 1e-05, %v1591_v59 }
0x13a1   :  { %1961 = vrsqrt.f32 %v1592_v60  ;;  %vm1599_vm6 = vweird.f32 %v1592_v60 }
0x13a7   :  { %v1962_v0 = vpop.eup %1961 }
0x13a8   :  { %v1594_v1 = vmul.f32 %v1962_v0, %v1592_v60  ;;  %vm1600_vm5 = vweird.f32 %v1962_v0 }
0x13a9   :  { %vm1601_vm9 = vmor %vm1599_vm6, %vm1600_vm5 }
0x13aa   :  { %v1595_v2 = vmul.f32 %v1962_v0, %v1594_v1 }
0x13ac   :  { %v1596_v25 = vmul.f32 0.5, %v1595_v2 }
0x13ae   :  { %v1597_v3 = vsub.f32 1.5, %v1596_v25 }
0x13b0   :  { %v1598_v4 = vmul.f32 %v1962_v0, %v1597_v3 }
0x13b2   :  { %v1602_v7 = vsel %vm1601_vm9, %v1962_v0, %v1598_v4 }
0x13b3   :  { %v1603_v51 = vmul.f32 %v1602_v7, %v1578_v43  ;;  %v1604_v8 = vmul.f32 %v1602_v7, %v1579_v45 }
0x13b5   :  { %v1606_v10 = vmul.f32 %v1605_v6, %v1603_v51  ;;  %v1607_v11 = vmul.f32 %v1605_v6, %v1604_v8 }
0x13b7   :  { %v1609_v12 = vadd.f32 %v1608_v9, %v1606_v10  ;;  %v1610_v13 = vadd.f32 %v1608_v9, %v1607_v11 }
0x13b9   :  { %v1611_v14 = vmax.f32 %v1609_v12, 0.0  ;;  %v1612_v56 = vmax.f32 %v1610_v13, 0.0 }
0x13bb   :  { %v1614_v15 = vpack.c.bf16 %v1612_v56, %v1611_v14 }
0x13bd   :  { %1625 = vmatpush.bf16.msrb.mxu1 %v1614_v15 }
0x13c0   :  { %1818 = vmatmul.msk.bf16.vlgmr.msrb.gmra.mxu1 %vm220_vm7, %v1613_v52  ;;  %vm1684_vm7 = vcmask 17408  }
0x143d   :  { %v1627_v18 = vpop.f32.mrf.mxu1 }
0x143e   :  { %v1631_v19 = vpack.c.bf16 %v1627_v18, %v1627_v18 }
0x1440   :  { %1835 = vmatmul.msk.bf16.vlgmr.msrb.gmra.mxu2 %vm376_vm8, %v1631_v19 }
0x1445   :  { %v1629_v5 = vpop.f32.mrf.mxu1 }
0x14c3   :  { %v1680_v20 = vpop.f32.mrf.mxu2 }
0x14c4   :  { %v1681_v21 = vadd.f32 %v1868_v44, %v1680_v20 }
0x14c6   :  { %1685 = vst.msk [vmem:[#allocation7] sm:$0x3] %vm1684_vm7, %v1681_v21 }
0x14c7   :  { %1696 = dma.vmem_to_hbm [thread:$0]  %s1692_s30, 32, %s1694_s4, [#allocation4]  }
0x14cb   :  { %v1682_v22 = vpop.f32.mrf.mxu2 }
0x14cc   :  { %2039 = dma.done.wait [#allocation4], 32  }
0x14cd   :  { %2040 = vsyncadd [#allocation4], 4294967264 }
0x14ce   :  { %1701 = vsyncpa [#allocation3], 1 }
0x14cf   :  { %1702 = vsyncpa [#allocation6], 1 }
0x14d0   :  { %1703 = vsyncpa [#allocation4], 1 }

</bundles_post_ra>
